<compile_context>
chip_gen: v7x
topology: tpu7x:2x2x1
jax: 0.10.0
libtpu: 0.0.40
codegen_flags: <defaults>
</compile_context>

<pallas_src>
import functools

import numpy as np
import jax
import jax.numpy as jnp
from jax.experimental import pallas as pl
from jax.experimental.pallas import tpu as pltpu


LANES = 384  # 3 vregs wide: lets fused GRU gate blocks sit at lanes 0 / 128 / 256


def _round8(n):
    return ((n + 7) // 8) * 8


# ----------------------------------------------------------------------------
# Parameter / operator slab packing (done once, outside jit)
# ----------------------------------------------------------------------------

def build_slab(params, g_src, s_dst, p_pool, *, d):
    """Pack weights, biases, graph operators and message helpers into one slab.

    Returns (slab_f32 (R, LANES), meta {name: (row_off, rows, cols)}, n_classes).
    """
    entries = []

    def add(name, a):
        a = np.asarray(a, np.float32)
        assert a.ndim == 2 and a.shape[1] <= LANES, (name, a.shape)
        entries.append((name, a))

    add("node_emb_w", params["node_emb"][0]); add("node_emb_b", params["node_emb"][1])
    add("edge_emb_w", params["edge_emb"][0]); add("edge_emb_b", params["edge_emb"][1])

    for l, layer in enumerate(params["layers"]):
        for k, (w, b) in enumerate(layer["edge_net"]):
            add(f"l{l}_e{k}_w", w); add(f"l{l}_e{k}_b", b)
        (w_ir, w_iz, w_in), (w_hr, w_hz, w_hn), \
            (b_ir, b_iz, b_in), (b_hr, b_hz, b_hn) = layer["gru"]

        def fuse(r_, z_, n_, rows):
            out = np.zeros((rows, 3 * 128), np.float32)
            out[:, 0:d] = np.asarray(r_)
            out[:, 128:128 + d] = np.asarray(z_)
            out[:, 256:256 + d] = np.asarray(n_)
            return out

        add(f"l{l}_gru_wi", fuse(w_ir, w_iz, w_in, d))
        add(f"l{l}_gru_wh", fuse(w_hr, w_hz, w_hn, d))
        add(f"l{l}_gru_bi", fuse(b_ir, b_iz, b_in, 1))
        add(f"l{l}_gru_bh", fuse(b_hr, b_hz, b_hn, 1))

    # i_net: split first weight into h / node blocks (avoids h_final concat).
    (w0, b0), (w1, b1), (w2, b2) = params["i_net"]
    w0 = np.asarray(w0)
    add("i0a_w", w0[:d]); add("i0b_w", w0[d:]); add("i0_b", b0)
    add("i1_w", w1); add("i1_b", b1); add("i2_w", w2); add("i2_b", b2)

    for k, (w, b) in enumerate(params["j_net"]):
        add(f"j{k}_w", w); add(f"j{k}_b", b)

    # out_net: last layer padded to 128 logits, pad lanes get a -1e30 bias so the
    # full-lane log_softmax equals the n_classes one on the real lanes.
    (ow0, ob0), (ow1, ob1) = params["out_net"]
    add("o0_w", ow0); add("o0_b", ob0)
    ow1 = np.asarray(ow1); ob1 = np.asarray(ob1)
    n_classes = ow1.shape[1]
    ow1p = np.zeros((ow1.shape[0], 128), np.float32); ow1p[:, :n_classes] = ow1
    ob1p = np.full((1, 128), -1e30, np.float32); ob1p[:, :n_classes] = ob1
    add("o1_w", ow1p); add("o1_b", ob1p)

    # graph operators (one-hot, exact in bf16) + message-matmul helpers
    add("g_src", g_src); add("s_dst", s_dst); add("p_pool", p_pool)
    rep = np.zeros((d, d * d), np.float32)        # (xj @ rep)[e, i*d+j] = xj[e, j]
    bsum = np.zeros((d * d, d), np.float32)       # block-sum over j for each i
    for i in range(d):
        for j in range(d):
            rep[j, i * d + j] = 1.0
            bsum[i * d + j, i] = 1.0
    add("rep", rep); add("bsum", bsum)

    meta, rows = {}, 0
    for name, a in entries:
        meta[name] = (rows, a.shape[0], a.shape[1])
        rows += _round8(a.shape[0])
    slab = np.zeros((max(rows, 8), LANES), np.float32)
    for name, a in entries:
        off = meta[name][0]
        slab[off:off + a.shape[0], :a.shape[1]] = a
    return jnp.asarray(slab), meta, n_classes


# ----------------------------------------------------------------------------
# Fused Pallas kernel
# ----------------------------------------------------------------------------

def _mpnn_fused_kernel(x_ref, ea_ref, slab_ref, out_ref, *,
                       meta, d, num_layers, edge_lin, fast):
    f32 = jnp.float32
    mxu = jnp.bfloat16 if fast else jnp.float32

    def mx(v):                       # MXU operand dtype (no-op on precise path)
        return v.astype(mxu)

    def view(name):                  # static slab view (already in MXU dtype)
        off, r, c = meta[name]
        return slab_ref[off:off + r, 0:c]

    def dot(a_m, b_m):               # MXU matmul, f32 accumulation
        return jnp.dot(a_m, b_m, preferred_element_type=f32)

    def linear(v_m, prefix, relu):
        y = dot(v_m, view(prefix + "_w")) + view(prefix + "_b").astype(f32)
        return jnp.maximum(y, 0.0) if relu else y

    # graph operators / message helpers (one-hot; hoisted reads)
    g_src = view("g_src"); s_dst = view("s_dst"); p_pool = view("p_pool")
    rep = view("rep"); bsum = view("bsum")

    node = linear(mx(x_ref[...]), "node_emb", relu=False)        # (N, D) f32
    eattr = linear(mx(ea_ref[...]), "edge_emb", relu=False)      # (E, De) f32

    h = node
    for l in range(num_layers):
        # edge_net MLP: (E, De) -> (E, D*D)
        emb = eattr
        for k in range(edge_lin):
            emb = linear(mx(emb), f"l{l}_e{k}", relu=(k != edge_lin - 1))
        h_m = mx(h)
        xj = dot(g_src, h_m)                                     # (E, D)  gather
        xrep = dot(mx(xj), rep)                                  # (E, D*D) replicate (MXU)
        msg = dot(mx(emb * xrep), bsum)                          # (E, D)  per-edge matvec
        aggr = dot(s_dst, mx(msg))                               # (N, D)  scatter-sum
        # fused GRUCell: 2 matmuls, gate blocks at lanes 0 / 128 / 256
        gx = dot(mx(aggr), view(f"l{l}_gru_wi")) + view(f"l{l}_gru_bi").astype(f32)
        gh = dot(h_m, view(f"l{l}_gru_wh")) + view(f"l{l}_gru_bh").astype(f32)
        r = jax.nn.sigmoid(gx[:, 0:d] + gh[:, 0:d])
        z = jax.nn.sigmoid(gx[:, 128:128 + d] + gh[:, 128:128 + d])
        n = jnp.tanh(gx[:, 256:256 + d] + r * gh[:, 256:256 + d])
        h = (1.0 - z) * n + z * h

    # ---- readout ----
    h_m = mx(h)
    node_m = mx(node)
    # i_net (first layer split over [h, node] -> no lane concatenate)
    t = jnp.maximum(dot(h_m, view("i0a_w")) + dot(node_m, view("i0b_w"))
                    + view("i0_b").astype(f32), 0.0)
    t = jnp.maximum(dot(mx(t), view("i1_w")) + view("i1_b").astype(f32), 0.0)
    i_out = dot(mx(t), view("i2_w")) + view("i2_b").astype(f32)            # (N, D)
    # j_net
    u = jnp.maximum(dot(h_m, view("j0_w")) + view("j0_b").astype(f32), 0.0)
    u = jnp.maximum(dot(mx(u), view("j1_w")) + view("j1_b").astype(f32), 0.0)
    j_out = dot(mx(u), view("j2_w")) + view("j2_b").astype(f32)            # (N, D)

    m_i = jnp.max(i_out, axis=-1, keepdims=True)
    e_i = jnp.exp(i_out - m_i)
    soft_i = e_i * pl.reciprocal(jnp.sum(e_i, axis=-1, keepdims=True), approx=fast)
    mult = soft_i * j_out                                                  # (N, D)
    pooled = dot(p_pool, mx(mult))                                         # (G, D)

    v = jnp.maximum(dot(mx(pooled), view("o0_w")) + view("o0_b").astype(f32), 0.0)
    logits = dot(mx(v), view("o1_w")) + view("o1_b").astype(f32)           # (G, 128)
    m_o = jnp.max(logits, axis=-1, keepdims=True)
    lse = jnp.log(jnp.sum(jnp.exp(logits - m_o), axis=-1, keepdims=True)) + m_o
    out_ref[...] = logits - lse          # single lane-dense (G, 128) store


def mpnn_forward(x, edge_attr, slab, *, meta, d, num_layers, edge_lin,
                 n_classes, fast=False):
    """Fused MPNN forward. Returns (num_graphs, num_classes) log-probs."""
    n_graphs = meta["p_pool"][1]
    kernel = functools.partial(_mpnn_fused_kernel, meta=meta, d=d,
                               num_layers=num_layers, edge_lin=edge_lin, fast=fast)
    slab = slab.astype(jnp.bfloat16 if fast else jnp.float32)
    out = pl.pallas_call(
        kernel,
        out_shape=jax.ShapeDtypeStruct((n_graphs, 128), jnp.float32),
        in_specs=[pl.BlockSpec(memory_space=pltpu.MemorySpace.VMEM)] * 3,
        out_specs=pl.BlockSpec(memory_space=pltpu.MemorySpace.VMEM),
        # No grid: the whole (toy-sized) problem is one block.  See TODO(synk)
        # at the top for the at-scale gridded / megacore-parallel variant.
    )(x, edge_attr, slab)
    return out[:, :n_classes]


# ----------------------------------------------------------------------------
# Pure-JAX reference (for correctness check)
# ----------------------------------------------------------------------------

def reference_forward(x, edge_attr, src, dst, batch, params, *, d, n_nodes, n_graphs):
    def ff(v, layers):
        last = len(layers) - 1
        for k, (w, b) in enumerate(layers):
            v = v @ w + b
            if k != last:
                v = jnp.maximum(v, 0.0)
        return v

    node = x @ params["node_emb"][0] + params["node_emb"][1]
    eattr = edge_attr @ params["edge_emb"][0] + params["edge_emb"][1]
    h = node
    for layer in params["layers"]:
        emb = ff(eattr, layer["edge_net"]).reshape(-1, d, d)
        xj = h[src]
        msg = jnp.einsum("eij,ej->ei", emb, xj)
        aggr = jax.ops.segment_sum(msg, dst, num_segments=n_nodes)
        (w_ir, w_iz, w_in), (w_hr, w_hz, w_hn), \
            (b_ir, b_iz, b_in), (b_hr, b_hz, b_hn) = layer["gru"]
        r = jax.nn.sigmoid(aggr @ w_ir + b_ir + h @ w_hr + b_hr)
        z = jax.nn.sigmoid(aggr @ w_iz + b_iz + h @ w_hz + b_hz)
        n = jnp.tanh(aggr @ w_in + b_in + r * (h @ w_hn + b_hn))
        h = (1.0 - z) * n + z * h
    h_final = jnp.concatenate([h, node], axis=-1)
    i_out = ff(h_final, params["i_net"])
    j_out = ff(h, params["j_net"])
    mult = jax.nn.softmax(i_out, axis=-1) * j_out
    pooled = jax.ops.segment_sum(mult, batch, num_segments=n_graphs)
    out = ff(pooled, params["out_net"])
    return jax.nn.log_softmax(out, axis=-1)


# ----------------------------------------------------------------------------
# Deterministic parameter init (shapes follow the PyTorch module's __init__)
# ----------------------------------------------------------------------------

def init_linear(key, fin, fout):
    kw, kb = jax.random.split(key)
    s = 1.0 / (fin ** 0.5)
    w = jax.random.uniform(kw, (fin, fout), jnp.float32, minval=-s, maxval=s)
    b = jax.random.uniform(kb, (1, fout), jnp.float32, minval=-s, maxval=s)
    return w, b


def init_ff(key, fin, n_hidden, hidden, fout):
    dims = [fin] + [hidden] * n_hidden + [fout]
    keys = jax.random.split(key, len(dims) - 1)
    return [init_linear(k, dims[i], dims[i + 1]) for i, k in enumerate(keys)]


def init_gru(key, din, dh):
    ks = jax.random.split(key, 12)
    s = 1.0 / (dh ** 0.5)
    u = lambda k, shape: jax.random.uniform(k, shape, jnp.float32, minval=-s, maxval=s)
    w_i = tuple(u(ks[i], (din, dh)) for i in range(3))
    w_h = tuple(u(ks[3 + i], (dh, dh)) for i in range(3))
    b_i = tuple(u(ks[6 + i], (1, dh)) for i in range(3))
    b_h = tuple(u(ks[9 + i], (1, dh)) for i in range(3))
    return (w_i, w_h, b_i, b_h)


if __name__ == "__main__":
    # ---- config (small, consistent with the module) ----
    node_dim, edge_dim = 6, 4
    D = 8                      # node_embedding_dim
    De = 8                     # edge_embedding_dim
    Eh = 16                    # edge_hidden_dim
    edge_num_layers = 2
    num_propagation_steps = 2
    N, E, G = 8, 16, 2         # nodes, edges, graphs

    root = jax.random.PRNGKey(0)
    k_x, k_e, k_s0, k_d0, k_s1, k_d1, k_p = jax.random.split(root, 7)

    x = jax.random.normal(k_x, (N, node_dim), jnp.float32)
    edge_attr = jax.random.normal(k_e, (E, edge_dim), jnp.float32)
    # graph 0 = nodes 0..3, graph 1 = nodes 4..7; edges stay within their graph
    src = jnp.concatenate([jax.random.randint(k_s0, (E // 2,), 0, 4),
                           jax.random.randint(k_s1, (E // 2,), 0, 4) + 4])
    dst = jnp.concatenate([jax.random.randint(k_d0, (E // 2,), 0, 4),
                           jax.random.randint(k_d1, (E // 2,), 0, 4) + 4])
    batch = jnp.array([0, 0, 0, 0, 1, 1, 1, 1], dtype=jnp.int32)

    # dense one-hot operators for gather / scatter-sum / global_add_pool
    g_src = jax.nn.one_hot(src, N, dtype=jnp.float32)            # (E, N)
    s_dst = jax.nn.one_hot(dst, N, dtype=jnp.float32).T          # (N, E)
    p_pool = jax.nn.one_hot(batch, G, dtype=jnp.float32).T       # (G, N)

    # ---- parameters ----
    keys = jax.random.split(k_p, 6 + num_propagation_steps)
    params = {
        "node_emb": init_linear(keys[0], node_dim, D),
        "edge_emb": init_linear(keys[1], edge_dim, De),
        "layers": [
            {
                "edge_net": init_ff(jax.random.fold_in(keys[2 + l], 0),
                                    De, edge_num_layers, Eh, D * D),
                "gru": init_gru(jax.random.fold_in(keys[2 + l], 1), D, D),
            }
            for l in range(num_propagation_steps)
        ],
        "i_net": init_ff(keys[2 + num_propagation_steps], 2 * D, 2, 2 * D, D),
        "j_net": init_ff(keys[3 + num_propagation_steps], D, 2, 2 * D, D),
        "out_net": init_ff(keys[4 + num_propagation_steps], D, 1, 2 * D, 2),
    }

    # Pack everything into one tile-aligned slab (single DMA per call).
    slab_f32, meta, n_classes = build_slab(params, g_src, s_dst, p_pool, d=D)

    common = dict(meta=meta, d=D, num_layers=num_propagation_steps,
                  edge_lin=edge_num_layers + 1, n_classes=n_classes)
    fwd_f32 = jax.jit(functools.partial(mpnn_forward, fast=False, **common))
    fwd_bf16 = jax.jit(functools.partial(mpnn_forward, fast=True, **common))

    out_f32 = jax.block_until_ready(fwd_f32(x, edge_attr, slab_f32))
    out_bf16 = jax.block_until_ready(fwd_bf16(x, edge_attr, slab_f32))

    with jax.default_matmul_precision("highest"):
        ref = reference_forward(x, edge_attr, src, dst, batch, params,
                                d=D, n_nodes=N, n_graphs=G)

    assert out_f32.shape == (G, n_classes)
    assert out_bf16.shape == (G, n_classes)
    # f32 path: tight tolerance (residual covers EUP-vs-XLA transcendentals).
    assert jnp.allclose(out_f32, ref, atol=1e-3, rtol=1e-3), (out_f32, ref)
    # bf16-weight/operand fast path (v6e/v7x optimization): documented looser
    # tolerance; accumulation is still f32.
    assert jnp.allclose(out_bf16, ref, atol=1e-1, rtol=1e-1), (out_bf16, ref)

    print("KERNEL_OK")
</pallas_src>

<mosaic_0001>
module attributes {stable_mosaic.version = 11 : i64} {
  func.func @_mpnn_fused_kernel(%arg0: memref<8x6xf32, #tpu.memory_space<vmem>>, %arg1: memref<16x4xf32, #tpu.memory_space<vmem>>, %arg2: memref<504x384xf32, #tpu.memory_space<vmem>>, %arg3: memref<2x128xf32, #tpu.memory_space<vmem>>) attributes {dimension_semantics = [], scalar_prefetch = 0 : i64, scratch_operands = 0 : i64, tpu.core_type = #tpu.core_type<tc>} {
    %c400 = arith.constant 400 : index
    %c0 = arith.constant 0 : index
    %0 = vector.load %arg2[%c400, %c0] : memref<504x384xf32, #tpu.memory_space<vmem>>, vector<16x8xf32>
    %c416 = arith.constant 416 : index
    %c0_0 = arith.constant 0 : index
    %1 = vector.load %arg2[%c416, %c0_0] : memref<504x384xf32, #tpu.memory_space<vmem>>, vector<8x16xf32>
    %c424 = arith.constant 424 : index
    %c0_1 = arith.constant 0 : index
    %2 = vector.load %arg2[%c424, %c0_1] : memref<504x384xf32, #tpu.memory_space<vmem>>, vector<2x8xf32>
    %c432 = arith.constant 432 : index
    %c0_2 = arith.constant 0 : index
    %3 = vector.load %arg2[%c432, %c0_2] : memref<504x384xf32, #tpu.memory_space<vmem>>, vector<8x64xf32>
    %c440 = arith.constant 440 : index
    %c0_3 = arith.constant 0 : index
    %4 = vector.load %arg2[%c440, %c0_3] : memref<504x384xf32, #tpu.memory_space<vmem>>, vector<64x8xf32>
    %c0_4 = arith.constant 0 : index
    %c0_5 = arith.constant 0 : index
    %5 = vector.load %arg0[%c0_4, %c0_5] : memref<8x6xf32, #tpu.memory_space<vmem>>, vector<8x6xf32>
    %c0_6 = arith.constant 0 : index
    %c0_7 = arith.constant 0 : index
    %6 = vector.load %arg2[%c0_6, %c0_7] : memref<504x384xf32, #tpu.memory_space<vmem>>, vector<6x8xf32>
    %cst = arith.constant dense<0.000000e+00> : vector<8x8xf32>
    %7 = tpu.matmul %5, %6, %cst {dimension_numbers = #tpu.dot_dimension_numbers<[1], [0], [0], [1], [0, 0, 1, 1], [], []>} : vector<8x6xf32>, vector<6x8xf32>, vector<8x8xf32> -> vector<8x8xf32>
    %c8 = arith.constant 8 : index
    %c0_8 = arith.constant 0 : index
    %8 = vector.load %arg2[%c8, %c0_8] : memref<504x384xf32, #tpu.memory_space<vmem>>, vector<1x8xf32>
    %9 = vector.broadcast %8 : vector<1x8xf32> to vector<8x8xf32>
    %10 = arith.addf %7, %9 : vector<8x8xf32>
    %c0_9 = arith.constant 0 : index
    %c0_10 = arith.constant 0 : index
    %11 = vector.load %arg1[%c0_9, %c0_10] : memref<16x4xf32, #tpu.memory_space<vmem>>, vector<16x4xf32>
    %c16 = arith.constant 16 : index
    %c0_11 = arith.constant 0 : index
    %12 = vector.load %arg2[%c16, %c0_11] : memref<504x384xf32, #tpu.memory_space<vmem>>, vector<4x8xf32>
    %cst_12 = arith.constant dense<0.000000e+00> : vector<16x8xf32>
    %13 = tpu.matmul %11, %12, %cst_12 {dimension_numbers = #tpu.dot_dimension_numbers<[1], [0], [0], [1], [0, 0, 1, 1], [], []>} : vector<16x4xf32>, vector<4x8xf32>, vector<16x8xf32> -> vector<16x8xf32>
    %c24 = arith.constant 24 : index
    %c0_13 = arith.constant 0 : index
    %14 = vector.load %arg2[%c24, %c0_13] : memref<504x384xf32, #tpu.memory_space<vmem>>, vector<1x8xf32>
    %15 = vector.broadcast %14 : vector<1x8xf32> to vector<16x8xf32>
    %16 = arith.addf %13, %15 : vector<16x8xf32>
    %c32 = arith.constant 32 : index
    %c0_14 = arith.constant 0 : index
    %17 = vector.load %arg2[%c32, %c0_14] : memref<504x384xf32, #tpu.memory_space<vmem>>, vector<8x16xf32>
    %cst_15 = arith.constant dense<0.000000e+00> : vector<16x16xf32>
    %18 = tpu.matmul %16, %17, %cst_15 {dimension_numbers = #tpu.dot_dimension_numbers<[1], [0], [0], [1], [0, 0, 1, 1], [], []>} : vector<16x8xf32>, vector<8x16xf32>, vector<16x16xf32> -> vector<16x16xf32>
    %c40 = arith.constant 40 : index
    %c0_16 = arith.constant 0 : index
    %19 = vector.load %arg2[%c40, %c0_16] : memref<504x384xf32, #tpu.memory_space<vmem>>, vector<1x16xf32>
    %20 = vector.broadcast %19 : vector<1x16xf32> to vector<16x16xf32>
    %21 = arith.addf %18, %20 : vector<16x16xf32>
    %cst_17 = arith.constant 0.000000e+00 : f32
    %22 = vector.broadcast %cst_17 : f32 to vector<16x16xf32>
    %23 = arith.maximumf %21, %22 : vector<16x16xf32>
    %c48 = arith.constant 48 : index
    %c0_18 = arith.constant 0 : index
    %24 = vector.load %arg2[%c48, %c0_18] : memref<504x384xf32, #tpu.memory_space<vmem>>, vector<16x16xf32>
    %cst_19 = arith.constant dense<0.000000e+00> : vector<16x16xf32>
    %25 = tpu.matmul %23, %24, %cst_19 {dimension_numbers = #tpu.dot_dimension_numbers<[1], [0], [0], [1], [0, 0, 1, 1], [], []>} : vector<16x16xf32>, vector<16x16xf32>, vector<16x16xf32> -> vector<16x16xf32>
    %c64 = arith.constant 64 : index
    %c0_20 = arith.constant 0 : index
    %26 = vector.load %arg2[%c64, %c0_20] : memref<504x384xf32, #tpu.memory_space<vmem>>, vector<1x16xf32>
    %27 = vector.broadcast %26 : vector<1x16xf32> to vector<16x16xf32>
    %28 = arith.addf %25, %27 : vector<16x16xf32>
    %cst_21 = arith.constant 0.000000e+00 : f32
    %29 = vector.broadcast %cst_21 : f32 to vector<16x16xf32>
    %30 = arith.maximumf %28, %29 : vector<16x16xf32>
    %c72 = arith.constant 72 : index
    %c0_22 = arith.constant 0 : index
    %31 = vector.load %arg2[%c72, %c0_22] : memref<504x384xf32, #tpu.memory_space<vmem>>, vector<16x64xf32>
    %cst_23 = arith.constant dense<0.000000e+00> : vector<16x64xf32>
    %32 = tpu.matmul %30, %31, %cst_23 {dimension_numbers = #tpu.dot_dimension_numbers<[1], [0], [0], [1], [0, 0, 1, 1], [], []>} : vector<16x16xf32>, vector<16x64xf32>, vector<16x64xf32> -> vector<16x64xf32>
    %c88 = arith.constant 88 : index
    %c0_24 = arith.constant 0 : index
    %33 = vector.load %arg2[%c88, %c0_24] : memref<504x384xf32, #tpu.memory_space<vmem>>, vector<1x64xf32>
    %34 = vector.broadcast %33 : vector<1x64xf32> to vector<16x64xf32>
    %35 = arith.addf %32, %34 : vector<16x64xf32>
    %cst_25 = arith.constant dense<0.000000e+00> : vector<16x8xf32>
    %36 = tpu.matmul %0, %10, %cst_25 {dimension_numbers = #tpu.dot_dimension_numbers<[1], [0], [0], [1], [0, 0, 1, 1], [], []>} : vector<16x8xf32>, vector<8x8xf32>, vector<16x8xf32> -> vector<16x8xf32>
    %cst_26 = arith.constant dense<0.000000e+00> : vector<16x64xf32>
    %37 = tpu.matmul %36, %3, %cst_26 {dimension_numbers = #tpu.dot_dimension_numbers<[1], [0], [0], [1], [0, 0, 1, 1], [], []>} : vector<16x8xf32>, vector<8x64xf32>, vector<16x64xf32> -> vector<16x64xf32>
    %38 = arith.mulf %35, %37 : vector<16x64xf32>
    %cst_27 = arith.constant dense<0.000000e+00> : vector<16x8xf32>
    %39 = tpu.matmul %38, %4, %cst_27 {dimension_numbers = #tpu.dot_dimension_numbers<[1], [0], [0], [1], [0, 0, 1, 1], [], []>} : vector<16x64xf32>, vector<64x8xf32>, vector<16x8xf32> -> vector<16x8xf32>
    %cst_28 = arith.constant dense<0.000000e+00> : vector<8x8xf32>
    %40 = tpu.matmul %1, %39, %cst_28 {dimension_numbers = #tpu.dot_dimension_numbers<[1], [0], [0], [1], [0, 0, 1, 1], [], []>} : vector<8x16xf32>, vector<16x8xf32>, vector<8x8xf32> -> vector<8x8xf32>
    %c96 = arith.constant 96 : index
    %c0_29 = arith.constant 0 : index
    %41 = vector.load %arg2[%c96, %c0_29] : memref<504x384xf32, #tpu.memory_space<vmem>>, vector<8x384xf32>
    %cst_30 = arith.constant dense<0.000000e+00> : vector<8x384xf32>
    %42 = tpu.matmul %40, %41, %cst_30 {dimension_numbers = #tpu.dot_dimension_numbers<[1], [0], [0], [1], [0, 0, 1, 1], [], []>} : vector<8x8xf32>, vector<8x384xf32>, vector<8x384xf32> -> vector<8x384xf32>
    %c112 = arith.constant 112 : index
    %c0_31 = arith.constant 0 : index
    %43 = vector.load %arg2[%c112, %c0_31] : memref<504x384xf32, #tpu.memory_space<vmem>>, vector<1x384xf32>
    %44 = vector.broadcast %43 : vector<1x384xf32> to vector<8x384xf32>
    %45 = arith.addf %42, %44 : vector<8x384xf32>
    %c104 = arith.constant 104 : index
    %c0_32 = arith.constant 0 : index
    %46 = vector.load %arg2[%c104, %c0_32] : memref<504x384xf32, #tpu.memory_space<vmem>>, vector<8x384xf32>
    %cst_33 = arith.constant dense<0.000000e+00> : vector<8x384xf32>
    %47 = tpu.matmul %10, %46, %cst_33 {dimension_numbers = #tpu.dot_dimension_numbers<[1], [0], [0], [1], [0, 0, 1, 1], [], []>} : vector<8x8xf32>, vector<8x384xf32>, vector<8x384xf32> -> vector<8x384xf32>
    %c120 = arith.constant 120 : index
    %c0_34 = arith.constant 0 : index
    %48 = vector.load %arg2[%c120, %c0_34] : memref<504x384xf32, #tpu.memory_space<vmem>>, vector<1x384xf32>
    %49 = vector.broadcast %48 : vector<1x384xf32> to vector<8x384xf32>
    %50 = arith.addf %47, %49 : vector<8x384xf32>
    %51 = vector.extract_strided_slice %45 {offsets = [0, 0], sizes = [8, 8], strides = [1, 1]} : vector<8x384xf32> to vector<8x8xf32>
    %52 = vector.extract_strided_slice %50 {offsets = [0, 0], sizes = [8, 8], strides = [1, 1]} : vector<8x384xf32> to vector<8x8xf32>
    %53 = arith.addf %51, %52 : vector<8x8xf32>
    %54 = arith.negf %53 : vector<8x8xf32>
    %55 = math.exp %54 : vector<8x8xf32>
    %cst_35 = arith.constant 1.000000e+00 : f32
    %56 = vector.broadcast %cst_35 : f32 to vector<8x8xf32>
    %57 = arith.addf %56, %55 : vector<8x8xf32>
    %58 = arith.divf %56, %57 : vector<8x8xf32>
    %59 = vector.extract_strided_slice %45 {offsets = [0, 128], sizes = [8, 8], strides = [1, 1]} : vector<8x384xf32> to vector<8x8xf32>
    %60 = vector.extract_strided_slice %50 {offsets = [0, 128], sizes = [8, 8], strides = [1, 1]} : vector<8x384xf32> to vector<8x8xf32>
    %61 = arith.addf %59, %60 : vector<8x8xf32>
    %62 = arith.negf %61 : vector<8x8xf32>
    %63 = math.exp %62 : vector<8x8xf32>
    %cst_36 = arith.constant 1.000000e+00 : f32
    %64 = vector.broadcast %cst_36 : f32 to vector<8x8xf32>
    %65 = arith.addf %64, %63 : vector<8x8xf32>
    %66 = arith.divf %64, %65 : vector<8x8xf32>
    %67 = vector.extract_strided_slice %45 {offsets = [0, 256], sizes = [8, 8], strides = [1, 1]} : vector<8x384xf32> to vector<8x8xf32>
    %68 = vector.extract_strided_slice %50 {offsets = [0, 256], sizes = [8, 8], strides = [1, 1]} : vector<8x384xf32> to vector<8x8xf32>
    %69 = arith.mulf %58, %68 : vector<8x8xf32>
    %70 = arith.addf %67, %69 : vector<8x8xf32>
    %71 = math.tanh %70 : vector<8x8xf32>
    %cst_37 = arith.constant 1.000000e+00 : f32
    %72 = vector.broadcast %cst_37 : f32 to vector<8x8xf32>
    %73 = arith.subf %72, %66 : vector<8x8xf32>
    %74 = arith.mulf %73, %71 : vector<8x8xf32>
    %75 = arith.mulf %66, %10 : vector<8x8xf32>
    %76 = arith.addf %74, %75 : vector<8x8xf32>
    %c128 = arith.constant 128 : index
    %c0_38 = arith.constant 0 : index
    %77 = vector.load %arg2[%c128, %c0_38] : memref<504x384xf32, #tpu.memory_space<vmem>>, vector<8x16xf32>
    %cst_39 = arith.constant dense<0.000000e+00> : vector<16x16xf32>
    %78 = tpu.matmul %16, %77, %cst_39 {dimension_numbers = #tpu.dot_dimension_numbers<[1], [0], [0], [1], [0, 0, 1, 1], [], []>} : vector<16x8xf32>, vector<8x16xf32>, vector<16x16xf32> -> vector<16x16xf32>
    %c136 = arith.constant 136 : index
    %c0_40 = arith.constant 0 : index
    %79 = vector.load %arg2[%c136, %c0_40] : memref<504x384xf32, #tpu.memory_space<vmem>>, vector<1x16xf32>
    %80 = vector.broadcast %79 : vector<1x16xf32> to vector<16x16xf32>
    %81 = arith.addf %78, %80 : vector<16x16xf32>
    %cst_41 = arith.constant 0.000000e+00 : f32
    %82 = vector.broadcast %cst_41 : f32 to vector<16x16xf32>
    %83 = arith.maximumf %81, %82 : vector<16x16xf32>
    %c144 = arith.constant 144 : index
    %c0_42 = arith.constant 0 : index
    %84 = vector.load %arg2[%c144, %c0_42] : memref<504x384xf32, #tpu.memory_space<vmem>>, vector<16x16xf32>
    %cst_43 = arith.constant dense<0.000000e+00> : vector<16x16xf32>
    %85 = tpu.matmul %83, %84, %cst_43 {dimension_numbers = #tpu.dot_dimension_numbers<[1], [0], [0], [1], [0, 0, 1, 1], [], []>} : vector<16x16xf32>, vector<16x16xf32>, vector<16x16xf32> -> vector<16x16xf32>
    %c160 = arith.constant 160 : index
    %c0_44 = arith.constant 0 : index
    %86 = vector.load %arg2[%c160, %c0_44] : memref<504x384xf32, #tpu.memory_space<vmem>>, vector<1x16xf32>
    %87 = vector.broadcast %86 : vector<1x16xf32> to vector<16x16xf32>
    %88 = arith.addf %85, %87 : vector<16x16xf32>
    %cst_45 = arith.constant 0.000000e+00 : f32
    %89 = vector.broadcast %cst_45 : f32 to vector<16x16xf32>
    %90 = arith.maximumf %88, %89 : vector<16x16xf32>
    %c168 = arith.constant 168 : index
    %c0_46 = arith.constant 0 : index
    %91 = vector.load %arg2[%c168, %c0_46] : memref<504x384xf32, #tpu.memory_space<vmem>>, vector<16x64xf32>
    %cst_47 = arith.constant dense<0.000000e+00> : vector<16x64xf32>
    %92 = tpu.matmul %90, %91, %cst_47 {dimension_numbers = #tpu.dot_dimension_numbers<[1], [0], [0], [1], [0, 0, 1, 1], [], []>} : vector<16x16xf32>, vector<16x64xf32>, vector<16x64xf32> -> vector<16x64xf32>
    %c184 = arith.constant 184 : index
    %c0_48 = arith.constant 0 : index
    %93 = vector.load %arg2[%c184, %c0_48] : memref<504x384xf32, #tpu.memory_space<vmem>>, vector<1x64xf32>
    %94 = vector.broadcast %93 : vector<1x64xf32> to vector<16x64xf32>
    %95 = arith.addf %92, %94 : vector<16x64xf32>
    %cst_49 = arith.constant dense<0.000000e+00> : vector<16x8xf32>
    %96 = tpu.matmul %0, %76, %cst_49 {dimension_numbers = #tpu.dot_dimension_numbers<[1], [0], [0], [1], [0, 0, 1, 1], [], []>} : vector<16x8xf32>, vector<8x8xf32>, vector<16x8xf32> -> vector<16x8xf32>
    %cst_50 = arith.constant dense<0.000000e+00> : vector<16x64xf32>
    %97 = tpu.matmul %96, %3, %cst_50 {dimension_numbers = #tpu.dot_dimension_numbers<[1], [0], [0], [1], [0, 0, 1, 1], [], []>} : vector<16x8xf32>, vector<8x64xf32>, vector<16x64xf32> -> vector<16x64xf32>
    %98 = arith.mulf %95, %97 : vector<16x64xf32>
    %cst_51 = arith.constant dense<0.000000e+00> : vector<16x8xf32>
    %99 = tpu.matmul %98, %4, %cst_51 {dimension_numbers = #tpu.dot_dimension_numbers<[1], [0], [0], [1], [0, 0, 1, 1], [], []>} : vector<16x64xf32>, vector<64x8xf32>, vector<16x8xf32> -> vector<16x8xf32>
    %cst_52 = arith.constant dense<0.000000e+00> : vector<8x8xf32>
    %100 = tpu.matmul %1, %99, %cst_52 {dimension_numbers = #tpu.dot_dimension_numbers<[1], [0], [0], [1], [0, 0, 1, 1], [], []>} : vector<8x16xf32>, vector<16x8xf32>, vector<8x8xf32> -> vector<8x8xf32>
    %c192 = arith.constant 192 : index
    %c0_53 = arith.constant 0 : index
    %101 = vector.load %arg2[%c192, %c0_53] : memref<504x384xf32, #tpu.memory_space<vmem>>, vector<8x384xf32>
    %cst_54 = arith.constant dense<0.000000e+00> : vector<8x384xf32>
    %102 = tpu.matmul %100, %101, %cst_54 {dimension_numbers = #tpu.dot_dimension_numbers<[1], [0], [0], [1], [0, 0, 1, 1], [], []>} : vector<8x8xf32>, vector<8x384xf32>, vector<8x384xf32> -> vector<8x384xf32>
    %c208 = arith.constant 208 : index
    %c0_55 = arith.constant 0 : index
    %103 = vector.load %arg2[%c208, %c0_55] : memref<504x384xf32, #tpu.memory_space<vmem>>, vector<1x384xf32>
    %104 = vector.broadcast %103 : vector<1x384xf32> to vector<8x384xf32>
    %105 = arith.addf %102, %104 : vector<8x384xf32>
    %c200 = arith.constant 200 : index
    %c0_56 = arith.constant 0 : index
    %106 = vector.load %arg2[%c200, %c0_56] : memref<504x384xf32, #tpu.memory_space<vmem>>, vector<8x384xf32>
    %cst_57 = arith.constant dense<0.000000e+00> : vector<8x384xf32>
    %107 = tpu.matmul %76, %106, %cst_57 {dimension_numbers = #tpu.dot_dimension_numbers<[1], [0], [0], [1], [0, 0, 1, 1], [], []>} : vector<8x8xf32>, vector<8x384xf32>, vector<8x384xf32> -> vector<8x384xf32>
    %c216 = arith.constant 216 : index
    %c0_58 = arith.constant 0 : index
    %108 = vector.load %arg2[%c216, %c0_58] : memref<504x384xf32, #tpu.memory_space<vmem>>, vector<1x384xf32>
    %109 = vector.broadcast %108 : vector<1x384xf32> to vector<8x384xf32>
    %110 = arith.addf %107, %109 : vector<8x384xf32>
    %111 = vector.extract_strided_slice %105 {offsets = [0, 0], sizes = [8, 8], strides = [1, 1]} : vector<8x384xf32> to vector<8x8xf32>
    %112 = vector.extract_strided_slice %110 {offsets = [0, 0], sizes = [8, 8], strides = [1, 1]} : vector<8x384xf32> to vector<8x8xf32>
    %113 = arith.addf %111, %112 : vector<8x8xf32>
    %114 = arith.negf %113 : vector<8x8xf32>
    %115 = math.exp %114 : vector<8x8xf32>
    %cst_59 = arith.constant 1.000000e+00 : f32
    %116 = vector.broadcast %cst_59 : f32 to vector<8x8xf32>
    %117 = arith.addf %116, %115 : vector<8x8xf32>
    %118 = arith.divf %116, %117 : vector<8x8xf32>
    %119 = vector.extract_strided_slice %105 {offsets = [0, 128], sizes = [8, 8], strides = [1, 1]} : vector<8x384xf32> to vector<8x8xf32>
    %120 = vector.extract_strided_slice %110 {offsets = [0, 128], sizes = [8, 8], strides = [1, 1]} : vector<8x384xf32> to vector<8x8xf32>
    %121 = arith.addf %119, %120 : vector<8x8xf32>
    %122 = arith.negf %121 : vector<8x8xf32>
    %123 = math.exp %122 : vector<8x8xf32>
    %cst_60 = arith.constant 1.000000e+00 : f32
    %124 = vector.broadcast %cst_60 : f32 to vector<8x8xf32>
    %125 = arith.addf %124, %123 : vector<8x8xf32>
    %126 = arith.divf %124, %125 : vector<8x8xf32>
    %127 = vector.extract_strided_slice %105 {offsets = [0, 256], sizes = [8, 8], strides = [1, 1]} : vector<8x384xf32> to vector<8x8xf32>
    %128 = vector.extract_strided_slice %110 {offsets = [0, 256], sizes = [8, 8], strides = [1, 1]} : vector<8x384xf32> to vector<8x8xf32>
    %129 = arith.mulf %118, %128 : vector<8x8xf32>
    %130 = arith.addf %127, %129 : vector<8x8xf32>
    %131 = math.tanh %130 : vector<8x8xf32>
    %cst_61 = arith.constant 1.000000e+00 : f32
    %132 = vector.broadcast %cst_61 : f32 to vector<8x8xf32>
    %133 = arith.subf %132, %126 : vector<8x8xf32>
    %134 = arith.mulf %133, %131 : vector<8x8xf32>
    %135 = arith.mulf %126, %76 : vector<8x8xf32>
    %136 = arith.addf %134, %135 : vector<8x8xf32>
    %c224 = arith.constant 224 : index
    %c0_62 = arith.constant 0 : index
    %137 = vector.load %arg2[%c224, %c0_62] : memref<504x384xf32, #tpu.memory_space<vmem>>, vector<8x16xf32>
    %cst_63 = arith.constant dense<0.000000e+00> : vector<8x16xf32>
    %138 = tpu.matmul %136, %137, %cst_63 {dimension_numbers = #tpu.dot_dimension_numbers<[1], [0], [0], [1], [0, 0, 1, 1], [], []>} : vector<8x8xf32>, vector<8x16xf32>, vector<8x16xf32> -> vector<8x16xf32>
    %c232 = arith.constant 232 : index
    %c0_64 = arith.constant 0 : index
    %139 = vector.load %arg2[%c232, %c0_64] : memref<504x384xf32, #tpu.memory_space<vmem>>, vector<8x16xf32>
    %cst_65 = arith.constant dense<0.000000e+00> : vector<8x16xf32>
    %140 = tpu.matmul %10, %139, %cst_65 {dimension_numbers = #tpu.dot_dimension_numbers<[1], [0], [0], [1], [0, 0, 1, 1], [], []>} : vector<8x8xf32>, vector<8x16xf32>, vector<8x16xf32> -> vector<8x16xf32>
    %141 = arith.addf %138, %140 : vector<8x16xf32>
    %c240 = arith.constant 240 : index
    %c0_66 = arith.constant 0 : index
    %142 = vector.load %arg2[%c240, %c0_66] : memref<504x384xf32, #tpu.memory_space<vmem>>, vector<1x16xf32>
    %143 = vector.broadcast %142 : vector<1x16xf32> to vector<8x16xf32>
    %144 = arith.addf %141, %143 : vector<8x16xf32>
    %cst_67 = arith.constant 0.000000e+00 : f32
    %145 = vector.broadcast %cst_67 : f32 to vector<8x16xf32>
    %146 = arith.maximumf %144, %145 : vector<8x16xf32>
    %c248 = arith.constant 248 : index
    %c0_68 = arith.constant 0 : index
    %147 = vector.load %arg2[%c248, %c0_68] : memref<504x384xf32, #tpu.memory_space<vmem>>, vector<16x16xf32>
    %cst_69 = arith.constant dense<0.000000e+00> : vector<8x16xf32>
    %148 = tpu.matmul %146, %147, %cst_69 {dimension_numbers = #tpu.dot_dimension_numbers<[1], [0], [0], [1], [0, 0, 1, 1], [], []>} : vector<8x16xf32>, vector<16x16xf32>, vector<8x16xf32> -> vector<8x16xf32>
    %c264 = arith.constant 264 : index
    %c0_70 = arith.constant 0 : index
    %149 = vector.load %arg2[%c264, %c0_70] : memref<504x384xf32, #tpu.memory_space<vmem>>, vector<1x16xf32>
    %150 = vector.broadcast %149 : vector<1x16xf32> to vector<8x16xf32>
    %151 = arith.addf %148, %150 : vector<8x16xf32>
    %cst_71 = arith.constant 0.000000e+00 : f32
    %152 = vector.broadcast %cst_71 : f32 to vector<8x16xf32>
    %153 = arith.maximumf %151, %152 : vector<8x16xf32>
    %c272 = arith.constant 272 : index
    %c0_72 = arith.constant 0 : index
    %154 = vector.load %arg2[%c272, %c0_72] : memref<504x384xf32, #tpu.memory_space<vmem>>, vector<16x8xf32>
    %cst_73 = arith.constant dense<0.000000e+00> : vector<8x8xf32>
    %155 = tpu.matmul %153, %154, %cst_73 {dimension_numbers = #tpu.dot_dimension_numbers<[1], [0], [0], [1], [0, 0, 1, 1], [], []>} : vector<8x16xf32>, vector<16x8xf32>, vector<8x8xf32> -> vector<8x8xf32>
    %c288 = arith.constant 288 : index
    %c0_74 = arith.constant 0 : index
    %156 = vector.load %arg2[%c288, %c0_74] : memref<504x384xf32, #tpu.memory_space<vmem>>, vector<1x8xf32>
    %157 = vector.broadcast %156 : vector<1x8xf32> to vector<8x8xf32>
    %158 = arith.addf %155, %157 : vector<8x8xf32>
    %c296 = arith.constant 296 : index
    %c0_75 = arith.constant 0 : index
    %159 = vector.load %arg2[%c296, %c0_75] : memref<504x384xf32, #tpu.memory_space<vmem>>, vector<8x16xf32>
    %cst_76 = arith.constant dense<0.000000e+00> : vector<8x16xf32>
    %160 = tpu.matmul %136, %159, %cst_76 {dimension_numbers = #tpu.dot_dimension_numbers<[1], [0], [0], [1], [0, 0, 1, 1], [], []>} : vector<8x8xf32>, vector<8x16xf32>, vector<8x16xf32> -> vector<8x16xf32>
    %c304 = arith.constant 304 : index
    %c0_77 = arith.constant 0 : index
    %161 = vector.load %arg2[%c304, %c0_77] : memref<504x384xf32, #tpu.memory_space<vmem>>, vector<1x16xf32>
    %162 = vector.broadcast %161 : vector<1x16xf32> to vector<8x16xf32>
    %163 = arith.addf %160, %162 : vector<8x16xf32>
    %cst_78 = arith.constant 0.000000e+00 : f32
    %164 = vector.broadcast %cst_78 : f32 to vector<8x16xf32>
    %165 = arith.maximumf %163, %164 : vector<8x16xf32>
    %c312 = arith.constant 312 : index
    %c0_79 = arith.constant 0 : index
    %166 = vector.load %arg2[%c312, %c0_79] : memref<504x384xf32, #tpu.memory_space<vmem>>, vector<16x16xf32>
    %cst_80 = arith.constant dense<0.000000e+00> : vector<8x16xf32>
    %167 = tpu.matmul %165, %166, %cst_80 {dimension_numbers = #tpu.dot_dimension_numbers<[1], [0], [0], [1], [0, 0, 1, 1], [], []>} : vector<8x16xf32>, vector<16x16xf32>, vector<8x16xf32> -> vector<8x16xf32>
    %c328 = arith.constant 328 : index
    %c0_81 = arith.constant 0 : index
    %168 = vector.load %arg2[%c328, %c0_81] : memref<504x384xf32, #tpu.memory_space<vmem>>, vector<1x16xf32>
    %169 = vector.broadcast %168 : vector<1x16xf32> to vector<8x16xf32>
    %170 = arith.addf %167, %169 : vector<8x16xf32>
    %cst_82 = arith.constant 0.000000e+00 : f32
    %171 = vector.broadcast %cst_82 : f32 to vector<8x16xf32>
    %172 = arith.maximumf %170, %171 : vector<8x16xf32>
    %c336 = arith.constant 336 : index
    %c0_83 = arith.constant 0 : index
    %173 = vector.load %arg2[%c336, %c0_83] : memref<504x384xf32, #tpu.memory_space<vmem>>, vector<16x8xf32>
    %cst_84 = arith.constant dense<0.000000e+00> : vector<8x8xf32>
    %174 = tpu.matmul %172, %173, %cst_84 {dimension_numbers = #tpu.dot_dimension_numbers<[1], [0], [0], [1], [0, 0, 1, 1], [], []>} : vector<8x16xf32>, vector<16x8xf32>, vector<8x8xf32> -> vector<8x8xf32>
    %c352 = arith.constant 352 : index
    %c0_85 = arith.constant 0 : index
    %175 = vector.load %arg2[%c352, %c0_85] : memref<504x384xf32, #tpu.memory_space<vmem>>, vector<1x8xf32>
    %176 = vector.broadcast %175 : vector<1x8xf32> to vector<8x8xf32>
    %177 = arith.addf %174, %176 : vector<8x8xf32>
    %cst_86 = arith.constant dense<0xFF800000> : vector<8xf32>
    %178 = vector.multi_reduction <maximumf>, %158, %cst_86 [1] : vector<8x8xf32> to vector<8xf32>
    %179 = vector.shape_cast %178 : vector<8xf32> to vector<8x1xf32>
    %180 = vector.broadcast %179 : vector<8x1xf32> to vector<8x8xf32>
    %181 = arith.subf %158, %180 : vector<8x8xf32>
    %182 = math.exp %181 : vector<8x8xf32>
    %cst_87 = arith.constant dense<0.000000e+00> : vector<8xf32>
    %183 = vector.multi_reduction <add>, %182, %cst_87 [1] : vector<8x8xf32> to vector<8xf32>
    %184 = vector.shape_cast %183 : vector<8xf32> to vector<8x1xf32>
    %185 = tpu.reciprocal %184 : vector<8x1xf32> -> vector<8x1xf32>
    %186 = vector.broadcast %185 : vector<8x1xf32> to vector<8x8xf32>
    %187 = arith.mulf %182, %186 : vector<8x8xf32>
    %188 = arith.mulf %187, %177 : vector<8x8xf32>
    %cst_88 = arith.constant dense<0.000000e+00> : vector<2x8xf32>
    %189 = tpu.matmul %2, %188, %cst_88 {dimension_numbers = #tpu.dot_dimension_numbers<[1], [0], [0], [1], [0, 0, 1, 1], [], []>} : vector<2x8xf32>, vector<8x8xf32>, vector<2x8xf32> -> vector<2x8xf32>
    %c360 = arith.constant 360 : index
    %c0_89 = arith.constant 0 : index
    %190 = vector.load %arg2[%c360, %c0_89] : memref<504x384xf32, #tpu.memory_space<vmem>>, vector<8x16xf32>
    %cst_90 = arith.constant dense<0.000000e+00> : vector<2x16xf32>
    %191 = tpu.matmul %189, %190, %cst_90 {dimension_numbers = #tpu.dot_dimension_numbers<[1], [0], [0], [1], [0, 0, 1, 1], [], []>} : vector<2x8xf32>, vector<8x16xf32>, vector<2x16xf32> -> vector<2x16xf32>
    %c368 = arith.constant 368 : index
    %c0_91 = arith.constant 0 : index
    %192 = vector.load %arg2[%c368, %c0_91] : memref<504x384xf32, #tpu.memory_space<vmem>>, vector<1x16xf32>
    %193 = vector.broadcast %192 : vector<1x16xf32> to vector<2x16xf32>
    %194 = arith.addf %191, %193 : vector<2x16xf32>
    %cst_92 = arith.constant 0.000000e+00 : f32
    %195 = vector.broadcast %cst_92 : f32 to vector<2x16xf32>
    %196 = arith.maximumf %194, %195 : vector<2x16xf32>
    %c376 = arith.constant 376 : index
    %c0_93 = arith.constant 0 : index
    %197 = vector.load %arg2[%c376, %c0_93] : memref<504x384xf32, #tpu.memory_space<vmem>>, vector<16x128xf32>
    %cst_94 = arith.constant dense<0.000000e+00> : vector<2x128xf32>
    %198 = tpu.matmul %196, %197, %cst_94 {dimension_numbers = #tpu.dot_dimension_numbers<[1], [0], [0], [1], [0, 0, 1, 1], [], []>} : vector<2x16xf32>, vector<16x128xf32>, vector<2x128xf32> -> vector<2x128xf32>
    %c392 = arith.constant 392 : index
    %c0_95 = arith.constant 0 : index
    %199 = vector.load %arg2[%c392, %c0_95] : memref<504x384xf32, #tpu.memory_space<vmem>>, vector<1x128xf32>
    %200 = vector.broadcast %199 : vector<1x128xf32> to vector<2x128xf32>
    %201 = arith.addf %198, %200 : vector<2x128xf32>
    %cst_96 = arith.constant dense<0xFF800000> : vector<2xf32>
    %202 = vector.multi_reduction <maximumf>, %201, %cst_96 [1] : vector<2x128xf32> to vector<2xf32>
    %203 = vector.shape_cast %202 : vector<2xf32> to vector<2x1xf32>
    %204 = vector.broadcast %203 : vector<2x1xf32> to vector<2x128xf32>
    %205 = arith.subf %201, %204 : vector<2x128xf32>
    %206 = math.exp %205 : vector<2x128xf32>
    %cst_97 = arith.constant dense<0.000000e+00> : vector<2xf32>
    %207 = vector.multi_reduction <add>, %206, %cst_97 [1] : vector<2x128xf32> to vector<2xf32>
    %208 = vector.shape_cast %207 : vector<2xf32> to vector<2x1xf32>
    %209 = math.log %208 : vector<2x1xf32>
    %210 = arith.addf %209, %203 : vector<2x1xf32>
    %211 = vector.broadcast %210 : vector<2x1xf32> to vector<2x128xf32>
    %212 = arith.subf %201, %211 : vector<2x128xf32>
    %c0_98 = arith.constant 0 : index
    %c0_99 = arith.constant 0 : index
    %213 = vector.load %arg3[%c0_98, %c0_99] : memref<2x128xf32, #tpu.memory_space<vmem>>, vector<2x128xf32>
    tpu.vector_store %arg3[%c0_98, %c0_99], %212 {strides = array<i32>} : memref<2x128xf32, #tpu.memory_space<vmem>>, vector<2x128xf32>,
    return
  }
}

</mosaic_0001>

<bundles_post_ra>
// kernel: mpnn_forward.1
= control target key start
LH: loop header
LB: loop body
LE: loop exit
PB: predicated region body
PF: predicated region fallthrough
CT: control target
= control target key end

     0   :  { %8 = vsyncpa [#allocation3], 0  ;;  %s3605_s0 = inlined_call_operand.vmem [shape: f32[8,6], index: 0, kind: input, shape index: {}]   ;;  %s3606_s1 = inlined_call_operand.vmem [shape: f32[16,4], index: 1, kind: input, shape index: {}]   ;;  %s3607_s2 = inlined_call_operand.hbm [shape: f32[504,384], index: 2, kind: input, shape index: {}]   ;;  %s3608_s3 = inlined_call_operand.hbm [shape: f32[2,128], index: 3, kind: output, shape index: {}]  }
   0x1   :  { %9 = vsyncpa [#allocation4], 0  ;;  %s3358_s12 = smov [#allocation2]   ;;  %s3310_s16 = scalar_lea.hbm %s3607_s2, 24192 }
   0x2   :  { %s19_s13 = sshll.u32 %s3358_s12, 4  ;;  %p3311_p0 = scmp.ne.s32.totalorder %s3607_s2, %s3310_s16  ;;  %s20_s13 = int_to_ptr.vmem [resolvable:$true] %s19_s13 }
   0x3   :  { %p3314_p1 = scmp.lt.u32.totalorder %s3310_s16, %s3607_s2 }
   0x5   :  { %p3316_p2 = pnand %p3314_p1, %p3311_p0 }
   0x7   :  { %3319 = shalt.err (!%p3316_p2)
}
   0x8   :  { %s3320_s21 = scalar_lea.vmem %s20_s13, 24192  ;;  %p3325_p4 = scmp.lt.s32.totalorder %s20_s13, %s20_s13 }
   0x9   :  { %p3321_p3 = scmp.ne.s32.totalorder %s20_s13, %s3320_s21  ;;  %p3326_p5 = scmp.lt.s32.totalorder %s3320_s21, %s3320_s21 }
   0xb   :  { %p3327_p6 = por %p3326_p5, %p3325_p4 }
   0xd   :  { %p3328_p7 = pnand %p3327_p6, %p3321_p3 }
   0xf   :  { %3331 = shalt.err (!%p3328_p7)
}
  0x10   :  { %s3359_s22 = smov 384   ;;  %s3360_s23 = smov 24  }
  0x11   :  { %25 = dma.hbm_to_vmem [thread:$0]  %s3607_s2, 24192, %s20_s13, [#allocation3], %s3359_s22, %s3359_s22, %s3360_s23  }
  0x12   :  { %3354 = dma.done.wait [#allocation3], 24192  }
  0x13   :  { %3355 = vsyncadd [#allocation3], 4294943104  ;;  %v3361_v0 = vmov 0.0   ;;  %vm3362_vm0 = vmmov 0   ;;  %vm134_vm1 = vcmask 1043456   ;;  %vm127_vm2 = vcmask 31744  }
  0x14   :  { %2994 = vmatprep.subr.mxu0 %v3361_v0  ;;  %2996 = vmatprep.mubr.msk.f32.mxu0 %vm3362_vm0, %v3361_v0  ;;  %vm49_vm3 = vcmask 1045504   ;;  %v125_v1 = vld [vmem:[#allocation2 + $0x30] sm:$0xf]  ;;  %v123_v2 = vld [vmem:[%s3606_s1] sm:$0xff]  ;;  %v124_v3 = vld [vmem:[%s3606_s1 + $0x8] sm:$0xff]  ;;  %vm45_vm4 = vcmask 48128  }
  0x15   :  { %2999 = vmatprep.subr.msk.mxu1 %vm134_vm1, %v125_v1  ;;  %3001 = vmatprep.mubr.msk.f32.mxu1 %vm127_vm2, %v123_v2  ;;  %v43_v4 = vld [vmem:[#allocation2] sm:$0x3f]  ;;  %v299_v7 = vld [vmem:[#allocation2 + $0x90] sm:$0xff]  ;;  %v300_v8 = vld [vmem:[#allocation2 + $0xa8] sm:$0xff]  ;;  %vm215_vm5 = vcmask 64512   ;;  %vm302_vm6 = vcmask 130048  }
  0x16   :  { %v42_v5 = vld [vmem:[%s3605_s0] sm:$0xff]  ;;  %3000 = vmatpush3.msk.msra.mxu1 %vm134_vm1, %v125_v1  ;;  %2995 = vmatpush3.msk.msra.mxu0 %vm49_vm3, %v43_v4  ;;  %v3194_v9 = vpack.c.bf16 %v300_v8, %v299_v7  ;;  %v44_v10 = vld [vmem:[#allocation2 + $0x18] ss:$0 sm:$0xff]  ;;  %v126_v11 = vld [vmem:[#allocation2 + $0x48] ss:$0 sm:$0xff]  ;;  %vm634_vm7 = vcmask 523264  }
  0x17   :  { %3002 = vmatmul.mubr.msk.f32.vlgmr.msra.gmra.mrb[0].mxu1 %vm127_vm2, %v124_v3  ;;  %2997 = vmatmul.mubr.msk.f32.vlgmr.msra.gmra.mrb[0].mxu0 %vm45_vm4, %v42_v5  ;;  %v213_v6 = vld [vmem:[#allocation2 + $0x60] sm:$0xff]  ;;  %v214_v19 = vld [vmem:[#allocation2 + $0x78] ss:$0 sm:$0xff]  ;;  %v3420_v26 = vld [vmem:[#allocation2 + $0x4b0] sm:$0xff]  ;;  %v3363_v63 = vmov 0.0|0.0   ;;  %vm2813_vm8 = vcmask 1041408  }
  0x18   :  { %3004 = vmatprep.subr.mxu0 %v213_v6  ;;  %3195 = vmatprep.subr.bf16.mxu1 %v3194_v9  ;;  %v3427_v27 = vld [vmem:[#allocation2 + $0x4c8] sm:$0xff]  ;;  %v386_v28 = vld [vmem:[#allocation2 + $0xd8] sm:$0xff]  ;;  %v387_v29 = vld [vmem:[#allocation2 + $0xf0] sm:$0xff]  ;;  %s3364_s0 = smov [#allocation5]  }
  0x19   :  { %3005 = vmatpush3.msra.mxu0 %v213_v6  ;;  %3197 = vmatpush3.bf16.msra.mxu1 %v3194_v9  ;;  %v3198_v30 = vpack.c.bf16 %v387_v29, %v386_v28  ;;  %v3431_v31 = vld [vmem:[#allocation2 + $0x510] sm:$0xff]  ;;  %v34_v32 = vld [vmem:[#allocation2 + $0x528] sm:$0xff]  ;;  %v35_v33 = vld [vmem:[#allocation2 + $0x540] sm:$0xff]  ;;  %s2834_s1 = sshll.u32 %s3364_s0, 4  ;;  %s2835_s1 = int_to_ptr.vmem [resolvable:$true] %s2834_s1 }
  0x1a   :  { %v36_v34 = vld [vmem:[#allocation2 + $0x558] sm:$0xff]  ;;  %v3434_v35 = vpack.c.bf16 %v35_v33, %v34_v32  ;;  %v37_v36 = vld [vmem:[#allocation2 + $0x570] sm:$0xff]  ;;  %v301_v38 = vld [vmem:[#allocation2 + $0xc0] ss:$0 sm:$0xff]  ;;  %s3332_s4 = scalar_lea.vmem %s2835_s1, 32  ;;  %p3337_p9 = scmp.lt.s32.totalorder %s2835_s1, %s2835_s1 }
  0x1b   :  { %3199 = vmatprep.subr.bf16.mxu0 %v3198_v30  ;;  %v3436_v37 = vpack.c.bf16 %v37_v36, %v36_v34  ;;  %v38_v47 = vld [vmem:[#allocation2 + $0x588] sm:$0xff]  ;;  %v39_v48 = vld [vmem:[#allocation2 + $0x5a0] sm:$0xff]  ;;  %v40_v50 = vld [vmem:[#allocation2 + $0x5b8] sm:$0xff]  ;;  %p3333_p8 = scmp.ne.s32.totalorder %s2835_s1, %s3332_s4  ;;  %p3338_p10 = scmp.lt.s32.totalorder %s3332_s4, %s3332_s4 }
  0x1c   :  { %v3449_v49 = vpack.c.bf16 %v39_v48, %v38_v47  ;;  %v41_v51 = vld [vmem:[#allocation2 + $0x5d0] sm:$0xff]  ;;  %v388_v54 = vld [vmem:[#allocation2 + $0x108] ss:$0 sm:$0xff]  ;;  %v3467_v6 = vld [vmem:[#allocation2 + $0x4e0] sm:$0xff] }
  0x1d   :  { %v3453_v52 = vpack.c.bf16 %v41_v51, %v40_v50  ;;  %v956_v62 = vld [vmem:[#allocation2 + $0x148] sm:$0xff]  ;;  %v789_v8 = vld [vmem:[#allocation2 + $0x120] sm:$0xff]  ;;  %v791_v9 = vld [vmem:[#allocation2 + $0x130] sm:$0xff]  ;;  %p3339_p11 = por %p3338_p10, %p3337_p9 }
  0x1e   :  { %v790_v4 = vld [vmem:[#allocation2 + $0x128] sm:$0xff] }
  0x1f   :  { %p3340_p12 = pnand %p3339_p11, %p3333_p8 }
  0xea   :  { %v3003_v12 = vpop.f32.mrb[0].mxu1  ;;  %v119_v13 = vpop.f32.mrb[0].mxu0 }
  0xeb   :  { %v204_v14 = vpop.f32.mrb[1].mxu1  ;;  %v3409_v15 = vadd.f32 %v119_v13, %v44_v10  ;;  %v2998_v16 = vpop.f32.mrb[1].mxu0  ;;  %v3413_v18 = vadd.f32 %v3003_v12, %v126_v11  ;;  %v954_v13 = vld [vmem:[#allocation2 + $0x138] sm:$0xff] }
  0xec   :  { %v3411_v17 = vadd.f32 %v204_v14, %v126_v11  ;;  %v955_v11 = vld [vmem:[#allocation2 + $0x140] sm:$0xff]  ;;  %v1219_v16 = vld [vmem:[#allocation2 + $0x1b0] sm:$0xff] }
  0xed   :  { %3023 = vmatprep.subr.mxu1 %v3409_v15  ;;  %v1140_v14 = vld [vmem:[#allocation2 + $0x180] sm:$0xff] }
  0xee   :  { %3006 = vmatprep.mubr.msk.f32.mxu0 %vm215_vm5, %v3411_v17 }
  0xef   :  { %3007 = vmatmul.mubr.msk.f32.vlgmr.msra.gmra.mrb[2].mxu0 %vm215_vm5, %v3413_v18 }
  0xf0   :  { %3201 = vmatpush3.bf16.msra.mxu0 %v3198_v30 }
  0xf1   :  { %3028 = vmatprep.subr.mxu0 %v3431_v31 }
 0x1c2   :  { %v3008_v20 = vpop.f32.mrb[2].mxu0 }
 0x1c3   :  { %v294_v21 = vadd.f32 %v3008_v20, %v214_v19  ;;  %v288_v22 = vpop.f32.mrb[3].mxu0 }
 0x1c4   :  { %v289_v23 = vadd.f32 %v288_v22, %v214_v19  ;;  %v1220_v19 = vld [vmem:[#allocation2 + $0x1c8] sm:$0xff] }
 0x1c5   :  { %v298_v25 = vmax.f32 %v294_v21, 0.0  ;;  %v3221_v20 = vpack.c.bf16 %v1220_v19, %v1219_v16  ;;  %v795_v21 = vlaneseq }
 0x1c6   :  { %v297_v24 = vmax.f32 %v289_v23, 0.0 }
 0x1c7   :  { %v796_v22 = vshrl.u32 %v795_v21, 7  ;;  %v1307_v21 = vld [vmem:[#allocation2 + $0x228] ss:$0 sm:$0xff] }
 0x1c8   :  { %3013 = vmatprep.mubr.msk.f32.mxu1 %vm302_vm6, %v297_v24  ;;  %v958_v24 = vld [vmem:[#allocation2 + $0x168] ss:$8 sm:$0x7] }
 0x1c9   :  { %3014 = vmatmul.mubr.msk.f32.vlgmr.msra.gmra.mrb[2].mxu1 %vm302_vm6, %v298_v25  ;;  %v3484_v23 = vsub.s32 0, %v796_v22  ;;  %v793_v25 = vld [vmem:[#allocation2 + $0x150] ss:$8 sm:$0x7]  ;;  %v3486_v28 = vsub.s32 1, %v796_v22 }
 0x1ca   :  { %3024 = vmatpush3.msra.mxu1 %v3409_v15  ;;  %3025 = vmatprep.mubr.msk.f32.mxu1 %vm215_vm5, %v3420_v26 }
 0x1cb   :  { %3203 = vmatprep.subr.bf16.mxu1 %v3434_v35  ;;  %v798_v29 = vrot.slane %v793_v25, %v3484_v23  ;;  %v967_v32 = vrot.slane %v958_v24, %v3486_v28 }
 0x1cd   :  { %3026 = vmatmul.mubr.msk.f32.vlgmr.msra.gmra.mrb[4].mxu1 %vm215_vm5, %v3427_v27 }
 0x1ce   :  { %3205 = vmatpush3.bf16.msra.mxu1 %v3434_v35 }
 0x1cf   :  { %3207 = vmatprep.subr.bf16.mxu1 %v3436_v37 }
 0x1d2   :  { %3209 = vmatpush3.bf16.msra.mxu1 %v3436_v37 }
 0x1d3   :  { %3211 = vmatprep.subr.bf16.mxu1 %v3449_v49 }
 0x1d6   :  { %3213 = vmatpush3.bf16.msra.mxu1 %v3449_v49 }
 0x1d7   :  { %3215 = vmatprep.subr.bf16.mxu1 %v3453_v52 }
 0x1da   :  { %3217 = vmatpush3.bf16.msra.mxu1 %v3453_v52 }
 0x1db   :  { %3064 = vmatprep.subr.mxu1 %v3361_v0 }
 0x29c   :  { %v3015_v39 = vpop.f32.mrb[2].mxu1 }
 0x29d   :  { %v381_v40 = vadd.f32 %v3015_v39, %v301_v38  ;;  %v375_v41 = vpop.f32.mrb[3].mxu1 }
 0x29e   :  { %v376_v42 = vadd.f32 %v375_v41, %v301_v38  ;;  %v1141_v41 = vld [vmem:[#allocation2 + $0x198] ss:$0 sm:$0xff] }
 0x29f   :  { %v385_v45 = vmax.f32 %v381_v40, 0.0 }
 0x2a0   :  { %v384_v43 = vmax.f32 %v376_v42, 0.0  ;;  %v3027_v44 = vpop.f32.mrb[4].mxu1 }
 0x2a1   :  { %v542_v46 = vpop.f32.mrb[5].mxu1 }
 0x2a2   :  { %3020 = vmatprep.mubr.msk.f32.mxu0 %vm302_vm6, %v384_v43 }
 0x2a3   :  { %3021 = vmatmul.mubr.msk.f32.vlgmr.msra.gmra.mrb[4].mxu0 %vm302_vm6, %v385_v45 }
 0x2a4   :  { %3030 = vmatprep.mubr.msk.f32.mxu0 %vm215_vm5, %v542_v46  ;;  %3029 = vmatpush3.msra.mxu0 %v3431_v31 }
 0x2a5   :  { %3218 = vmatprep.subr.bf16.mxu0 %v3363_v63 }
 0x2a7   :  { %3031 = vmatmul.mubr.msk.f32.vlgmr.msra.gmra.mrb[6].mxu0 %vm215_vm5, %v3027_v44 }
 0x2a8   :  { %3056 = vmatprep.mubr.msk.f32.mxu0 %vm3362_vm0, %v3361_v0 }
 0x376   :  { %v3022_v53 = vpop.f32.mrb[4].mxu0 }
 0x377   :  { %v461_v55 = vpop.f32.mrb[5].mxu0  ;;  %v467_v56 = vadd.f32 %v3022_v53, %v388_v54 }
 0x378   :  { %v462_v57 = vadd.f32 %v461_v55, %v388_v54  ;;  %v3496_v55 = vsub.s32 2, %v796_v22 }
 0x37a   :  { %v3032_v58 = vpop.f32.mrb[6].mxu0 }
 0x37b   :  { %v633_v59 = vmul.f32 %v3032_v58, %v467_v56  ;;  %v623_v60 = vpop.f32.mrb[7].mxu0  ;;  %v806_v58 = vrot.slane %v793_v25, %v3496_v55 }
 0x37c   :  { %v632_v61 = vmul.f32 %v623_v60, %v462_v57  ;;  %v971_v57 = vrot.slane %v958_v24, %v3496_v55 }
 0x37e   :  { %3049 = vmatprep.mubr.msk.f32.mxu1 %vm634_vm7, %v632_v61 }
 0x37f   :  { %3050 = vmatmul.mubr.msk.f32.vlgmr.msra.gmra.mrb[6].mxu1 %vm634_vm7, %v633_v59 }
 0x380   :  { %3065 = vmatpush3.msra.mxu1 %v956_v62  ;;  %3066 = vmatprep.mubr.msk.f32.mxu1 %vm3362_vm0, %v3361_v0 }
 0x381   :  { %3222 = vmatprep.subr.bf16.mxu1 %v3221_v20 }
 0x383   :  { %3067 = vmatmul.mubr.msk.f32.vlgmr.msra.gmra.mrb[8].mxu1 %vm215_vm5, %v3409_v15 }
 0x384   :  { %3224 = vmatpush3.bf16.msra.mxu1 %v3221_v20 }
 0x452   :  { %v3051_v1 = vpop.f32.mrb[6].mxu1 }
 0x453   :  { %v707_v2 = vpop.f32.mrb[7].mxu1 }
 0x454   :  { %v3219_v3 = vpack.c.bf16 %v3051_v1, %v707_v2 }
 0x456   :  { %3220 = vmatpush3.bf16.msra.mxu0 %v3219_v3  ;;  %v3465_v5 = vpop.f32.mrb[8].mxu1 }
 0x457   :  { %v3068_v7 = vpop.f32.mrb[9].mxu1  ;;  %813 = vmatprep.subr.mxu0 %v790_v4  ;;  %v1116_v60 = vadd.f32 %v3465_v5, %v971_v57  ;;  %v1305_v5 = vld [vmem:[#allocation2 + $0x1f8] sm:$0xff] }
 0x459   :  { %3057 = vmatmul.mubr.msk.f32.vlgmr.msra.gmra.mrb[8].mxu0 %vm302_vm6, %v3467_v6 }
 0x45a   :  { %877 = vmatprep.mubr.f32.mxu0 %v3361_v0  ;;  %814 = vmatpush1.msra.mxu0 %v789_v8 }
 0x45b   :  { %3059 = vmatprep.subr.mxu0 %v3361_v0 }
 0x52c   :  { %v785_v10 = vpop.f32.mrb[8].mxu0 }
 0x52d   :  { %v3058_v12 = vpop.f32.mrb[9].mxu0  ;;  %2861 = vmatmul.mubr.msk.f32.vlgmr.msra.gmra.mrb[10].mxu0 %vm215_vm5, %v785_v10 }
 0x52e   :  { %3060 = vmatpush3.msra.mxu0 %v791_v9  ;;  %3061 = vmatprep.mubr.msk.f32.mxu0 %vm3362_vm0, %v3361_v0 }
 0x52f   :  { %978 = vmatprep.subr.mxu0 %v955_v11 }
 0x531   :  { %3062 = vmatmul.mubr.msk.f32.vlgmr.msra.gmra.mrb[12].mxu0 %vm215_vm5, %v785_v10 }
 0x532   :  { %979 = vmatpush1.msra.mxu0 %v954_v13  ;;  %1042 = vmatprep.mubr.f32.mxu0 %v3361_v0 }
 0x533   :  { %3069 = vmatprep.subr.mxu0 %v1140_v14 }
 0x535   :  { %2863 = vmatmul.mubr.msk.f32.vlgmr.msra.gmra.mrb[10].mxu0 %vm215_vm5, %v3409_v15 }
 0x536   :  { %3071 = vmatprep.mubr.msk.f32.mxu0 %vm215_vm5, %v3411_v17  ;;  %3070 = vmatpush3.msra.mxu0 %v1140_v14  ;;  %v963_v17 = vrot.slane %v958_v24, %v3484_v23 }
 0x538   :  { %v3263_v34 = vadd.f32 %v963_v17, %v798_v29 }
 0x539   :  { %3072 = vmatmul.mubr.msk.f32.vlgmr.msra.gmra.mrb[14].mxu0 %vm215_vm5, %v3413_v18  ;;  %v802_v18 = vrot.slane %v793_v25, %v3486_v28 }
 0x53b   :  { %v3265_v38 = vadd.f32 %v967_v32, %v802_v18 }
 0x604   :  { %v950_v30 = vpop.f32.mrb[12].mxu0 }
 0x605   :  { %v3063_v33 = vpop.f32.mrb[13].mxu0  ;;  %v951_v62 = vadd.f32 %v950_v30, %v806_v58  ;;  %v1865_v30 = vld [vmem:[#allocation2 + $0x268] sm:$0xff] }
 0x608   :  { %v1044_v36 = vpop.f32.mrb[10].mxu0 }
 0x609   :  { %v3264_v39 = vadd.f32 %v3263_v34, %v1044_v36  ;;  %v1046_v40 = vpop.f32.mrb[11].mxu0  ;;  %v1699_v34 = vld [vmem:[#allocation2 + $0x248] sm:$0xff] }
 0x60a   :  { %v3266_v43 = vadd.f32 %v3265_v38, %v1046_v40  ;;  %v1700_v40 = vld [vmem:[#allocation2 + $0x250] sm:$0xff] }
 0x60b   :  { %v2865_v42 = vmul.f32 -1.442695, %v3264_v39  ;;  %v1698_v39 = vld [vmem:[#allocation2 + $0x240] sm:$0xff] }
 0x60c   :  { %v3073_v44 = vpop.f32.mrb[14].mxu0  ;;  %v2866_v48 = vmul.f32 -1.442695, %v3266_v43 }
 0x60d   :  { %3282 = vpow2.f32 %v2865_v42  ;;  %v1214_v45 = vadd.f32 %v3073_v44, %v1141_v41  ;;  %v1208_v46 = vpop.f32.mrb[15].mxu0  ;;  %v1864_v42 = vld [vmem:[#allocation2 + $0x260] sm:$0xff]  ;;  %v1863_v44 = vld [vmem:[#allocation2 + $0x258] sm:$0xff] }
 0x60e   :  { %v1209_v47 = vadd.f32 %v1208_v46, %v1141_v41  ;;  %3284 = vpow2.f32 %v2866_v48  ;;  %v1867_v46 = vld [vmem:[#allocation2 + $0x288] ss:$8 sm:$0x7] }
 0x60f   :  { %v1218_v51 = vmax.f32 %v1214_v45, 0.0  ;;  %v2049_v45 = vld [vmem:[#allocation2 + $0x2a0] sm:$0xff] }
 0x610   :  { %v1217_v50 = vmax.f32 %v1209_v47, 0.0  ;;  %v1702_v47 = vld [vmem:[#allocation2 + $0x270] ss:$8 sm:$0x7] }
 0x611   :  { %v1707_v48 = vrot.slane %v1702_v47, %v3484_v23 }
 0x612   :  { %3078 = vmatprep.mubr.msk.f32.mxu1 %vm302_vm6, %v1217_v50  ;;  %v1872_v50 = vrot.slane %v1867_v46, %v3484_v23 }
 0x613   :  { %3079 = vmatmul.mubr.msk.f32.vlgmr.msra.gmra.mrb[10].mxu1 %vm302_vm6, %v1218_v51 }
 0x614   :  { %3090 = vmatprep.mubr.msk.f32.mxu1 %vm215_vm5, %v3420_v26 }
 0x617   :  { %v3283_v53 = vpop.eup %3282 }
 0x618   :  { %v1123_v54 = vadd.f32 1.0, %v3283_v53  ;;  %v3285_v56 = vpop.eup %3284  ;;  %v1711_v53 = vrot.slane %v1702_v47, %v3486_v28 }
 0x619   :  { %v1130_v59 = vadd.f32 1.0, %v3285_v56 }
 0x61a   :  { %3286 = vrcp.f32 %v1123_v54  ;;  %v1876_v54 = vrot.slane %v1867_v46, %v3486_v28  ;;  %v1715_v28 = vrot.slane %v1702_v47, %v3496_v55 }
 0x61b   :  { %3288 = vrcp.f32 %v1130_v59 }
 0x61c   :  { %v3269_v58 = vadd.f32 %v1876_v54, %v1711_v53  ;;  %v2425_v54 = vld [vmem:[#allocation2 + $0x3d8] ss:$0 sm:$0xff] }
 0x624   :  { %v3287_v61 = vpop.eup %3286 }
 0x625   :  { %v1133_v1 = vmul.f32 %v3287_v61, %v1116_v60  ;;  %v3289_v26 = vpop.eup %3288 }
 0x626   :  { %v1136_v3 = vsub.f32 1.0, %v3289_v26  ;;  %v1138_v8 = vmul.f32 %v3289_v26, %v3409_v15 }
 0x627   :  { %v1134_v2 = vadd.f32 %v1133_v1, %v951_v62 }
 0x629   :  { %3290 = vtanh.f32 %v1134_v2 }
 0x633   :  { %v3291_v4 = vpop.eup %3290 }
 0x634   :  { %v1137_v7 = vmul.f32 %v3291_v4, %v1136_v3 }
 0x636   :  { %v3502_v9 = vadd.f32 %v1138_v8, %v1137_v7  ;;  %v1880_v7 = vrot.slane %v1867_v46, %v3496_v55  ;;  %v2197_v55 = vld [vmem:[#allocation2 + $0x2e8] sm:$0xff] }
 0x637   :  { %v2501_v46 = vld [vmem:[#allocation2 + $0x408] sm:$0xff] }
 0x638   :  { %3088 = vmatprep.subr.mxu1 %v3502_v9 }
 0x639   :  { %3089 = vmatpush3.msra.mxu1 %v3502_v9 }
 0x63a   :  { %3091 = vmatmul.mubr.msk.f32.vlgmr.msra.gmra.mrb[12].mxu1 %vm215_vm5, %v3427_v27  ;;  %3230 = vmatprep.subr.bf16.mxu1 %v3434_v35  ;;  %v1306_v27 = vld [vmem:[#allocation2 + $0x210] sm:$0xff] }
 0x63b   :  { %3232 = vmatpush3.bf16.msra.mxu1 %v3434_v35  ;;  %v3225_v10 = vpack.c.bf16 %v1306_v27, %v1305_v5  ;;  %v1221_v35 = vld [vmem:[#allocation2 + $0x1e0] ss:$0 sm:$0xff] }
 0x63c   :  { %3234 = vmatprep.subr.bf16.mxu1 %v3436_v37 }
 0x63d   :  { %3226 = vmatprep.subr.bf16.mxu0 %v3225_v10 }
 0x63e   :  { %3228 = vmatpush3.bf16.msra.mxu0 %v3225_v10 }
 0x63f   :  { %3236 = vmatpush3.bf16.msra.mxu1 %v3436_v37  ;;  %3093 = vmatprep.subr.mxu0 %v3431_v31 }
 0x640   :  { %3238 = vmatprep.subr.bf16.mxu1 %v3449_v49 }
 0x643   :  { %3240 = vmatpush3.bf16.msra.mxu1 %v3449_v49 }
 0x644   :  { %3242 = vmatprep.subr.bf16.mxu1 %v3453_v52 }
 0x647   :  { %3244 = vmatpush3.bf16.msra.mxu1 %v3453_v52 }
 0x648   :  { %3129 = vmatprep.subr.mxu1 %v3361_v0 }
 0x6e6   :  { %v3080_v11 = vpop.f32.mrb[10].mxu1 }
 0x6e7   :  { %v1300_v37 = vadd.f32 %v3080_v11, %v1221_v35  ;;  %v1294_v12 = vpop.f32.mrb[11].mxu1 }
 0x6e8   :  { %v1295_v13 = vadd.f32 %v1294_v12, %v1221_v35 }
 0x6e9   :  { %v1304_v49 = vmax.f32 %v1300_v37, 0.0 }
 0x6ea   :  { %v1303_v14 = vmax.f32 %v1295_v13, 0.0 }
 0x6ec   :  { %3085 = vmatprep.mubr.msk.f32.mxu0 %vm302_vm6, %v1303_v14 }
 0x6ed   :  { %3086 = vmatmul.mubr.msk.f32.vlgmr.msra.gmra.mrb[16].mxu0 %vm302_vm6, %v1304_v49 }
 0x6ee   :  { %3094 = vmatpush3.msra.mxu0 %v3431_v31 }
 0x6ef   :  { %3245 = vmatprep.subr.bf16.mxu0 %v3363_v63 }
 0x70d   :  { %v3092_v52 = vpop.f32.mrb[12].mxu1 }
 0x70e   :  { %v1455_v16 = vpop.f32.mrb[13].mxu1 }
 0x70f   :  { %3095 = vmatprep.mubr.msk.f32.mxu0 %vm215_vm5, %v1455_v16  ;;  %v2198_v16 = vld [vmem:[#allocation2 + $0x300] sm:$0xff] }
 0x710   :  { %3096 = vmatmul.mubr.msk.f32.vlgmr.msra.gmra.mrb[18].mxu0 %vm215_vm5, %v3092_v52 }
 0x711   :  { %3121 = vmatprep.mubr.msk.f32.mxu0 %vm3362_vm0, %v3361_v0 }
 0x7c0   :  { %v3087_v19 = vpop.f32.mrb[16].mxu0 }
 0x7c1   :  { %v1380_v20 = vpop.f32.mrb[17].mxu0  ;;  %v1386_v22 = vadd.f32 %v3087_v19, %v1307_v21  ;;  %v3249_v19 = vpack.c.bf16 %v2198_v16, %v2197_v55 }
 0x7c2   :  { %v1381_v24 = vadd.f32 %v1380_v20, %v1307_v21  ;;  %v2194_v21 = vld [vmem:[#allocation2 + $0x2d0] ss:$0 sm:$0xff] }
 0x7e3   :  { %v3097_v25 = vpop.f32.mrb[18].mxu0 }
 0x7e4   :  { %v1546_v29 = vmul.f32 %v3097_v25, %v1386_v22  ;;  %v1536_v17 = vpop.f32.mrb[19].mxu0 }
 0x7e5   :  { %v1545_v31 = vmul.f32 %v1536_v17, %v1381_v24  ;;  %v2350_v17 = vld [vmem:[#allocation2 + $0x378] sm:$0xff] }
 0x7e7   :  { %3114 = vmatprep.mubr.msk.f32.mxu1 %vm634_vm7, %v1545_v31  ;;  %v2275_v31 = vld [vmem:[#allocation2 + $0x348] sm:$0xff] }
 0x7e8   :  { %3115 = vmatmul.mubr.msk.f32.vlgmr.msra.gmra.mrb[14].mxu1 %vm634_vm7, %v1546_v29 }
 0x7e9   :  { %3130 = vmatpush3.msra.mxu1 %v1865_v30  ;;  %3131 = vmatprep.mubr.msk.f32.mxu1 %vm3362_vm0, %v3361_v0 }
 0x7ea   :  { %3139 = vmatprep.subr.mxu1 %v3361_v0 }
 0x7ec   :  { %3132 = vmatmul.mubr.msk.f32.vlgmr.msra.gmra.mrb[16].mxu1 %vm215_vm5, %v3502_v9 }
 0x7ed   :  { %3141 = vmatprep.mubr.msk.f32.mxu1 %vm3362_vm0, %v3361_v0  ;;  %3140 = vmatpush3.msra.mxu1 %v2049_v45  ;;  %v2500_v45 = vld [vmem:[#allocation2 + $0x3f0] sm:$0xff] }
 0x7ee   :  { %3251 = vmatprep.subr.bf16.mxu1 %v3363_v63  ;;  %v3258_v47 = vpack.c.bf16 %v2501_v46, %v2500_v45 }
 0x8bb   :  { %v3116_v18 = vpop.f32.mrb[14].mxu1 }
 0x8bc   :  { %v1619_v32 = vpop.f32.mrb[15].mxu1 }
 0x8bd   :  { %v3246_v33 = vpack.c.bf16 %v3116_v18, %v1619_v32  ;;  %v2199_v18 = vld [vmem:[#allocation2 + $0x318] ss:$0 sm:$0xff]  ;;  %v2423_v32 = vld [vmem:[#allocation2 + $0x3a8] sm:$0xff] }
 0x8bf   :  { %3247 = vmatpush3.bf16.msra.mxu0 %v3246_v33  ;;  %v2024_v36 = vpop.f32.mrb[16].mxu1  ;;  %v2424_v33 = vld [vmem:[#allocation2 + $0x3c0] sm:$0xff] }
 0x8c0   :  { %v3133_v38 = vpop.f32.mrb[17].mxu1  ;;  %1722 = vmatprep.subr.mxu0 %v1699_v34  ;;  %v2025_v5 = vadd.f32 %v2024_v36, %v1880_v7 }
 0x8c2   :  { %3122 = vmatmul.mubr.msk.f32.vlgmr.msra.gmra.mrb[20].mxu0 %vm302_vm6, %v3467_v6  ;;  %v2050_v6 = vld [vmem:[#allocation2 + $0x2b8] sm:$0xff] }
 0x8c3   :  { %1786 = vmatprep.mubr.f32.mxu0 %v3361_v0  ;;  %1723 = vmatpush1.msra.mxu0 %v1698_v39  ;;  %v2351_v39 = vld [vmem:[#allocation2 + $0x390] ss:$0 sm:$0xff] }
 0x8c4   :  { %3124 = vmatprep.subr.mxu0 %v3361_v0 }
 0x995   :  { %v1694_v41 = vpop.f32.mrb[20].mxu0 }
 0x996   :  { %v3123_v43 = vpop.f32.mrb[21].mxu0  ;;  %2880 = vmatmul.mubr.msk.f32.vlgmr.msra.gmra.mrb[22].mxu0 %vm215_vm5, %v1694_v41 }
 0x997   :  { %3125 = vmatpush3.msra.mxu0 %v1700_v40  ;;  %3126 = vmatprep.mubr.msk.f32.mxu0 %vm3362_vm0, %v3361_v0  ;;  %v3255_v40 = vpack.c.bf16 %v2424_v33, %v2423_v32 }
 0x998   :  { %1887 = vmatprep.subr.mxu0 %v1864_v42 }
 0x99a   :  { %3127 = vmatmul.mubr.msk.f32.vlgmr.msra.gmra.mrb[24].mxu0 %vm215_vm5, %v1694_v41 }
 0x99b   :  { %1888 = vmatpush1.msra.mxu0 %v1863_v44  ;;  %1951 = vmatprep.mubr.f32.mxu0 %v3361_v0 }
 0x99c   :  { %3134 = vmatprep.subr.mxu0 %v3361_v0 }
 0x99e   :  { %2882 = vmatmul.mubr.msk.f32.vlgmr.msra.gmra.mrb[22].mxu0 %vm215_vm5, %v3502_v9 }
 0x99f   :  { %3135 = vmatpush3.msra.mxu0 %v2050_v6  ;;  %3136 = vmatprep.mubr.msk.f32.mxu0 %vm3362_vm0, %v3361_v0 }
 0x9a0   :  { %3248 = vmatprep.subr.bf16.mxu0 %v3363_v63 }
 0x9a2   :  { %3137 = vmatmul.mubr.msk.f32.vlgmr.msra.gmra.mrb[26].mxu0 %vm215_vm5, %v3409_v15  ;;  %v3267_v15 = vadd.f32 %v1872_v50, %v1707_v48  ;;  %v2276_v48 = vld [vmem:[#allocation2 + $0x360] ss:$0 sm:$0xff] }
 0x9a3   :  { %3148 = vmatprep.mubr.msk.f32.mxu0 %vm3362_vm0, %v3361_v0  ;;  %3250 = vmatpush3.bf16.msra.mxu0 %v3249_v19 }
 0x9a4   :  { %3158 = vmatprep.subr.mxu0 %v3361_v0 }
 0xa6d   :  { %v1859_v51 = vpop.f32.mrb[24].mxu0 }
 0xa6e   :  { %v3128_v56 = vpop.f32.mrb[25].mxu0  ;;  %v1860_v10 = vadd.f32 %v1859_v51, %v1715_v28 }
 0xa71   :  { %v1953_v57 = vpop.f32.mrb[22].mxu0 }
 0xa72   :  { %v3268_v59 = vadd.f32 %v3267_v15, %v1953_v57  ;;  %v1955_v60 = vpop.f32.mrb[23].mxu0 }
 0xa73   :  { %v3270_v62 = vadd.f32 %v3269_v58, %v1955_v60 }
 0xa74   :  { %v2884_v61 = vmul.f32 -1.442695, %v3268_v59 }
 0xa75   :  { %v2117_v1 = vpop.f32.mrb[26].mxu0  ;;  %v2885_v26 = vmul.f32 -1.442695, %v3270_v62 }
 0xa76   :  { %3292 = vpow2.f32 %v2884_v61  ;;  %v3138_v2 = vpop.f32.mrb[27].mxu0 }
 0xa77   :  { %3294 = vpow2.f32 %v2885_v26 }
 0xa80   :  { %v3293_v3 = vpop.eup %3292 }
 0xa81   :  { %v2032_v23 = vadd.f32 1.0, %v3293_v3  ;;  %v3295_v4 = vpop.eup %3294 }
 0xa82   :  { %v2039_v8 = vadd.f32 1.0, %v3295_v4  ;;  %v2502_v4 = vld [vmem:[#allocation2 + $0x420] ss:$0 sm:$0xff] }
 0xa83   :  { %3296 = vrcp.f32 %v2032_v23 }
 0xa84   :  { %3298 = vrcp.f32 %v2039_v8 }
 0xa8d   :  { %v3297_v27 = vpop.eup %3296 }
 0xa8e   :  { %v2042_v35 = vmul.f32 %v3297_v27, %v2025_v5  ;;  %v3299_v37 = vpop.eup %3298  ;;  %v32_v27 = vld [vmem:[#allocation2 + $0x4f8] sm:$0x3] }
 0xa8f   :  { %v2045_v12 = vsub.f32 1.0, %v3299_v37  ;;  %v2047_v49 = vmul.f32 %v3299_v37, %v3502_v9  ;;  %v2274_v9 = vld [vmem:[#allocation2 + $0x330] sm:$0xff]  ;;  %v2737_v37 = vld [vmem:[#allocation2 + $0x468] sm:$0xff] }
 0xa90   :  { %v2043_v11 = vadd.f32 %v2042_v35, %v1860_v10  ;;  %v3252_v30 = vpack.c.bf16 %v2275_v31, %v2274_v9  ;;  %v2661_v10 = vld [vmem:[#allocation2 + $0x438] sm:$0xff] }
 0xa92   :  { %3300 = vtanh.f32 %v2043_v11 }
 0xa9c   :  { %v3301_v13 = vpop.eup %3300 }
 0xa9d   :  { %v2046_v14 = vmul.f32 %v3301_v13, %v2045_v12  ;;  %v2738_v12 = vld [vmem:[#allocation2 + $0x480] sm:$0xff] }
 0xa9e   :  { %v3261_v13 = vpack.c.bf16 %v2738_v12, %v2737_v37 }
 0xa9f   :  { %v2048_v52 = vadd.f32 %v2047_v49, %v2046_v14  ;;  %v2662_v14 = vld [vmem:[#allocation2 + $0x450] ss:$0 sm:$0xff] }
 0xaa1   :  { %3142 = vmatmul.mubr.msk.f32.vlgmr.msra.gmra.mrb[18].mxu1 %vm215_vm5, %v2048_v52 }
 0xaa2   :  { %3155 = vmatprep.mubr.msk.f32.mxu1 %vm3362_vm0, %v3361_v0  ;;  %3253 = vmatpush3.bf16.msra.mxu1 %v3252_v30 }
 0xaa3   :  { %3254 = vmatprep.subr.bf16.mxu1 %v3363_v63 }
 0xb74   :  { %v2190_v20 = vpop.f32.mrb[18].mxu1 }
 0xb75   :  { %v2191_v22 = vadd.f32 %v2190_v20, %v2117_v1  ;;  %v3143_v24 = vpop.f32.mrb[19].mxu1 }
 0xb77   :  { %v2195_v25 = vadd.f32 %v2194_v21, %v2191_v22 }
 0xb79   :  { %v2196_v29 = vmax.f32 %v2195_v25, 0.0 }
 0xb7b   :  { %3149 = vmatmul.mubr.msk.f32.vlgmr.msra.gmra.mrb[28].mxu0 %vm302_vm6, %v2196_v29 }
 0xb7c   :  { %3159 = vmatpush3.msra.mxu0 %v2350_v17  ;;  %3160 = vmatprep.mubr.msk.f32.mxu0 %vm3362_vm0, %v3361_v0 }
 0xb7d   :  { %3257 = vmatprep.subr.bf16.mxu0 %v3363_v63 }
 0xb7f   :  { %3161 = vmatmul.mubr.msk.f32.vlgmr.msra.gmra.mrb[30].mxu0 %vm215_vm5, %v2048_v52 }
 0xb80   :  { %3174 = vmatprep.mubr.msk.f32.mxu0 %vm3362_vm0, %v3361_v0  ;;  %3259 = vmatpush3.bf16.msra.mxu0 %v3258_v47 }
 0xb81   :  { %3182 = vmatprep.subr.mxu0 %v3361_v0 }
 0xc4e   :  { %v2269_v34 = vpop.f32.mrb[28].mxu0 }
 0xc4f   :  { %v2270_v36 = vadd.f32 %v2269_v34, %v2199_v18  ;;  %v3150_v38 = vpop.f32.mrb[29].mxu0 }
 0xc51   :  { %v2273_v41 = vmax.f32 %v2270_v36, 0.0 }
 0xc52   :  { %v2418_v42 = vpop.f32.mrb[30].mxu0 }
 0xc53   :  { %v2419_v43 = vadd.f32 %v2418_v42, %v2351_v39  ;;  %3156 = vmatmul.mubr.msk.f32.vlgmr.msra.gmra.mrb[20].mxu1 %vm302_vm6, %v2273_v41  ;;  %v3162_v44 = vpop.f32.mrb[31].mxu0 }
 0xc54   :  { %3256 = vmatpush3.bf16.msra.mxu1 %v3255_v40  ;;  %3167 = vmatprep.mubr.msk.f32.mxu1 %vm3362_vm0, %v3361_v0 }
 0xc55   :  { %v2422_v6 = vmax.f32 %v2419_v43, 0.0  ;;  %3177 = vmatprep.subr.mxu1 %v3361_v0 }
 0xc57   :  { %3168 = vmatmul.mubr.msk.f32.vlgmr.msra.gmra.mrb[22].mxu1 %vm302_vm6, %v2422_v6 }
 0xc58   :  { %3179 = vmatprep.mubr.msk.f32.mxu1 %vm3362_vm0, %v3361_v0 }
 0xd26   :  { %v2346_v50 = vpop.f32.mrb[20].mxu1 }
 0xd27   :  { %v2347_v51 = vadd.f32 %v2346_v50, %v2276_v48  ;;  %v3157_v53 = vpop.f32.mrb[21].mxu1 }
 0xd29   :  { %v2576_v56 = vsel %vm215_vm5, %v2347_v51, -inf }
 0xd2a   :  { %2577 = vmax.xlane.f32.xlu0 %v2576_v56  ;;  %v2495_v15 = vpop.f32.mrb[22].mxu1 }
 0xd2b   :  { %v2496_v57 = vadd.f32 %v2495_v15, %v2425_v54  ;;  %v3169_v58 = vpop.f32.mrb[23].mxu1 }
 0xd2d   :  { %v2499_v59 = vmax.f32 %v2496_v57, 0.0 }
 0xd2f   :  { %3175 = vmatmul.mubr.msk.f32.vlgmr.msra.gmra.mrb[32].mxu0 %vm302_vm6, %v2499_v59 }
 0xd30   :  { %3184 = vmatprep.mubr.msk.f32.mxu0 %vm3362_vm0, %v3361_v0  ;;  %3183 = vmatpush3.msra.mxu0 %v2661_v10 }
 0xdb7   :  { %v2578_v60 = vpop.xlane.xlu0 %2577 }
 0xdb8   :  { %v2579_v61 = vsub.f32 %v2347_v51, %v2578_v60 }
 0xdba   :  { %v2580_v62 = vmul.f32 1.442695, %v2579_v61 }
 0xdbc   :  { %3302 = vpow2.f32 %v2580_v62 }
 0xdc6   :  { %v3303_v1 = vpop.eup %3302 }
 0xdc7   :  { %v2582_v2 = vsel %vm215_vm5, %v3303_v1, 0.0 }
 0xdc8   :  { %2583 = vadd.xlane.f32.xlu0 %v2582_v2 }
 0xe02   :  { %v2572_v26 = vpop.f32.mrb[32].mxu0 }
 0xe03   :  { %v3176_v3 = vpop.f32.mrb[33].mxu0  ;;  %v2573_v28 = vadd.f32 %v2572_v26, %v2502_v4 }
 0xe55   :  { %v2584_v23 = vpop.xlane.xlu0 %2583 }
 0xe56   :  { %3304 = vrcp.f32 %v2584_v23 }
 0xe60   :  { %v3305_v7 = vpop.eup %3304 }
 0xe61   :  { %v2586_v8 = vmul.f32 %v3305_v7, %v3303_v1 }
 0xe63   :  { %v2587_v5 = vmul.f32 %v2586_v8, %v2573_v28 }
 0xe65   :  { %3178 = vmatpush3.msra.mxu1 %v2587_v5 }
 0xe66   :  { %3180 = vmatmul.mubr.msk.f32.vlgmr.msra.gmra.mrb[24].mxu1 %vm215_vm5, %v32_v27  ;;  %3260 = vmatprep.subr.bf16.mxu1 %v3363_v63  ;;  %v2739_v63 = vld [vmem:[#allocation2 + $0x498] ss:$0 sm:$0xff] }
 0xe67   :  { %3191 = vmatprep.mubr.msk.f32.mxu1 %vm3362_vm0, %v3361_v0  ;;  %3262 = vmatpush3.bf16.msra.mxu1 %v3261_v13 }
 0xf39   :  { %v2657_v35 = vpop.f32.mrb[24].mxu1 }
 0xf3a   :  { %3185 = vmatmul.mubr.msk.f32.vlgmr.msra.gmra.mrb[34].mxu0 %vm215_vm5, %v2657_v35  ;;  %v3181_v11 = vpop.f32.mrb[25].mxu1 }
0x100d   :  { %v2732_v49 = vpop.f32.mrb[34].mxu0 }
0x100e   :  { %v2733_v52 = vadd.f32 %v2732_v49, %v2662_v14  ;;  %v3186_v55 = vpop.f32.mrb[35].mxu0 }
0x1010   :  { %v2736_v16 = vmax.f32 %v2733_v52, 0.0 }
0x1012   :  { %3192 = vmatmul.mubr.msk.f32.vlgmr.msra.gmra.mrb[26].mxu1 %vm302_vm6, %v2736_v16 }
0x10e5   :  { %v2809_v19 = vpop.f32.mrb[26].mxu1 }
0x10e6   :  { %v2810_v0 = vadd.f32 %v2809_v19, %v2739_v63  ;;  %v3193_v20 = vpop.f32.mrb[27].mxu1 }
0x10e8   :  { %v2814_v21 = vsel %vm2813_vm8, %v2810_v0, -inf }
0x10e9   :  { %2815 = vmax.xlane.f32.xlu1 %v2814_v21 }
0x1176   :  { %v2816_v22 = vpop.xlane.xlu1 %2815 }
0x1177   :  { %v2817_v24 = vsub.f32 %v2810_v0, %v2816_v22 }
0x1179   :  { %v2818_v25 = vmul.f32 1.442695, %v2817_v24 }
0x117b   :  { %3306 = vpow2.f32 %v2818_v25 }
0x1185   :  { %v3307_v29 = vpop.eup %3306 }
0x1186   :  { %v2820_v17 = vsel %vm2813_vm8, %v3307_v29, 0.0 }
0x1187   :  { %2821 = vadd.xlane.f32.xlu1 %v2820_v17 }
0x1214   :  { %v2822_v9 = vpop.xlane.xlu1 %2821 }
0x1215   :  { %3308 = vlog2.f32 %v2822_v9 }
0x121f   :  { %v3309_v31 = vpop.eup %3308 }
0x1220   :  { %v2824_v30 = vmul.f32 0.6931472, %v3309_v31 }
0x1222   :  { %v2825_v18 = vadd.f32 %v2824_v30, %v2816_v22 }
0x1224   :  { %v2826_v32 = vsub.f32 %v2810_v0, %v2825_v18 }
0x1226   :  { %2827 = vst [vmem:[#allocation5] sm:$0x3] %v2826_v32 }
0x1227   :  { %3343 = shalt.err (!%p3340_p12)
}
0x1228   :  { %s3344_s7 = scalar_lea.hbm %s3608_s3, 32 }
0x1229   :  { %p3345_p13 = scmp.ne.s32.totalorder %s3608_s3, %s3344_s7  ;;  %p3348_p0 = scmp.lt.u32.totalorder %s3344_s7, %s3608_s3 }
0x122b   :  { %p3350_p1 = pnand %p3348_p0, %p3345_p13 }
0x122d   :  { %3353 = shalt.err (!%p3350_p1)
}
0x122e   :  { %2837 = dma.vmem_to_hbm [thread:$0]  %s2835_s1, 32, %s3608_s3, [#allocation4]  }
0x122f   :  { %3356 = dma.done.wait [#allocation4], 32  }
0x1230   :  { %3357 = vsyncadd [#allocation4], 4294967264 }
0x1231   :  { %2841 = vsyncpa [#allocation3], 1 }
0x1232   :  { %2842 = vsyncpa [#allocation4], 1 }

</bundles_post_ra>
